<compile_context>
chip_gen: v5e
topology: v5e:2x2
jax: 0.10.0
libtpu: 0.0.40
codegen_flags: <defaults>
</compile_context>

<pallas_src>
import functools

import jax
import jax.numpy as jnp
from jax.experimental import pallas as pl
from jax.experimental.pallas import tpu as pltpu

LANE = 128  # lane-padded latent width


# ---------------------------------------------------------------------------
# Fused Pallas kernel: encoder -> (mu | logvar) -> reparameterize -> decoder
# ---------------------------------------------------------------------------
def _vae_fused_kernel(x_ref, eps_ref,                 # activations (batch-tiled)
                      w1_ref, b1_ref,                 # encoder fc1
                      wml_ref, bml_ref,               # packed [mu | logvar] projection
                      w2_ref, b2_ref,                 # decoder fc1
                      w3_ref, b3_ref,                 # decoder output head
                      recon_ref, mulogvar_ref):       # outputs
    f32 = jnp.float32
    bf16 = jnp.bfloat16
    lp = wml_ref.shape[1] // 2                        # lane-padded latent width (128)

    # ---- encode_: h = relu(x @ W1 + b1)  (bf16 MXU operands, f32 accumulate) ----
    h = jnp.dot(x_ref[...], w1_ref[...], preferred_element_type=f32)
    h = jnp.maximum(h + b1_ref[...], 0.0)

    # ---- single matmul for packed [mu | logvar]; one lane-dense HBM store ----
    ml = jnp.dot(h.astype(bf16), wml_ref[...], preferred_element_type=f32) + bml_ref[...]
    mulogvar_ref[...] = ml
    mu = ml[:, :lp]                                   # 128-lane aligned slices (free)
    logvar = ml[:, lp:]

    # ---- reparameterize: z = mu + exp(logvar/2) * eps ----
    # Pad lanes: mu=0, logvar=0 -> std=1, eps=0 -> z=0; W2 pad rows are zero anyway.
    z = mu + jnp.exp(0.5 * logvar) * eps_ref[...]

    # ---- decode_: dh = relu(z @ W2 + b2); recon = dh @ W3 + b3 (linear head) ----
    # TODO(synk): gin-injected decoder is unspecified; output head is left linear (no sigmoid).
    dh = jnp.dot(z.astype(bf16), w2_ref[...], preferred_element_type=f32)
    dh = jnp.maximum(dh + b2_ref[...], 0.0)
    recon = jnp.dot(dh.astype(bf16), w3_ref[...], preferred_element_type=f32)
    recon_ref[...] = (recon + b3_ref[...]).astype(recon_ref.dtype)


# ---------------------------------------------------------------------------
# Wrapper: one pallas_call for the whole forward pass
# ---------------------------------------------------------------------------
def vae_forward(params, x_nchw, key, *, latent):
    B, C, H, W = x_nchw.shape
    in_dim = C * H * W
    x = x_nchw.reshape(B, in_dim).astype(jnp.bfloat16)

    w1, b1 = params["enc_fc1"]
    wml, bml = params["enc_mulogvar"]
    w2, b2 = params["dec_fc1"]
    w3, b3 = params["dec_out"]
    hidden = w1.shape[1]
    lp = wml.shape[1] // 2                            # lane-padded latent width (128)

    # eps ~ N(0,1) on the real latent lanes, zero in pad lanes.
    eps = jnp.zeros((B, lp), jnp.float32)
    eps = eps.at[:, :latent].set(jax.random.normal(key, (B, latent), jnp.float32))

    # Batch tiling: full batch per tile for small B; 256-row tiles otherwise
    # (fills the v6e/v7x 2x256^2 MXU and amortizes per-grid-step overhead; at B>=512
    #  the grid has >=2 "parallel" tiles so v7x's two TensorCores are both used).
    tb = B if B <= 256 else 256
    assert B % tb == 0, "batch must be a multiple of the batch tile"
    grid = (B // tb,)

    flops = 2 * B * (in_dim * hidden + hidden * 2 * lp + lp * hidden + hidden * in_dim)
    bytes_accessed = (x.size * 2 + eps.size * 4
                      + w1.size * 2 + wml.size * 2 + w2.size * 2 + w3.size * 2
                      + b1.size * 4 + bml.size * 4 + b2.size * 4 + b3.size * 4
                      + B * in_dim * 2 + B * 2 * lp * 4)

    recon, mulogvar = pl.pallas_call(
        _vae_fused_kernel,
        out_shape=(jax.ShapeDtypeStruct((B, in_dim), jnp.bfloat16),   # recon (bf16 writeback)
                   jax.ShapeDtypeStruct((B, 2 * lp), jnp.float32)),   # packed [mu|logvar]
        grid_spec=pltpu.PrefetchScalarGridSpec(
            num_scalar_prefetch=0,
            grid=grid,
            in_specs=[
                pl.BlockSpec((tb, in_dim), lambda i: (i, 0)),        # x (tiled over batch)
                pl.BlockSpec((tb, lp), lambda i: (i, 0)),            # eps (tiled over batch)
                pl.BlockSpec((in_dim, hidden), lambda i: (0, 0)),    # W1 (replicated)
                pl.BlockSpec((1, hidden), lambda i: (0, 0)),         # b1
                pl.BlockSpec((hidden, 2 * lp), lambda i: (0, 0)),    # W_[mu|logvar] (padded)
                pl.BlockSpec((1, 2 * lp), lambda i: (0, 0)),         # b_[mu|logvar] (padded)
                pl.BlockSpec((lp, hidden), lambda i: (0, 0)),        # W2 (row-padded to 128)
                pl.BlockSpec((1, hidden), lambda i: (0, 0)),         # b2
                pl.BlockSpec((hidden, in_dim), lambda i: (0, 0)),    # W3
                pl.BlockSpec((1, in_dim), lambda i: (0, 0)),         # b3
            ],
            out_specs=(
                pl.BlockSpec((tb, in_dim), lambda i: (i, 0)),        # recon (lane-dense)
                pl.BlockSpec((tb, 2 * lp), lambda i: (i, 0)),        # packed [mu|logvar]
            ),
        ),
        compiler_params=pltpu.CompilerParams(
            dimension_semantics=("parallel",)),       # batch tiles shard across TCs (v7x)
        cost_estimate=pl.CostEstimate(flops=flops, transcendentals=B * lp,
                                      bytes_accessed=bytes_accessed),
    )(x, eps, w1, b1, wml, bml, w2, b2, w3, b3)

    mu = mulogvar[:, :latent]
    logvar = mulogvar[:, lp:lp + latent]
    return recon.reshape(B, C, H, W), mu, logvar


# ---------------------------------------------------------------------------
# Parameter construction (deterministic, in-script, latent path lane-padded to 128)
# ---------------------------------------------------------------------------
def init_vae_params(key, in_dim, hidden, latent, latent_pad=LANE):
    assert latent <= latent_pad
    ks = jax.random.split(key, 5)

    def dense(k, fan_in, fan_out):
        # PyTorch-style uniform(-1/sqrt(fan_in), 1/sqrt(fan_in)) init, deterministic.
        lim = 1.0 / jnp.sqrt(jnp.float32(fan_in))
        kw, kb = jax.random.split(k)
        w = jax.random.uniform(kw, (fan_in, fan_out), jnp.float32, -lim, lim)
        b = jax.random.uniform(kb, (fan_out,), jnp.float32, -lim, lim)
        return w, b

    w1, b1 = dense(ks[0], in_dim, hidden)
    wmu, bmu = dense(ks[1], hidden, latent)
    wlv, blv = dense(ks[2], hidden, latent)
    w2, b2 = dense(ks[3], latent, hidden)
    w3, b3 = dense(ks[4], hidden, in_dim)

    lp = latent_pad
    # Lane-pad mu/logvar heads to 128 lanes each (zero weight cols AND zero bias pad).
    wmu_p = jnp.zeros((hidden, lp), jnp.float32).at[:, :latent].set(wmu)
    wlv_p = jnp.zeros((hidden, lp), jnp.float32).at[:, :latent].set(wlv)
    bmu_p = jnp.zeros((lp,), jnp.float32).at[:latent].set(bmu)
    blv_p = jnp.zeros((lp,), jnp.float32).at[:latent].set(blv)
    # Pad W2 contraction dim to 128 (zero rows so padded z lanes contribute nothing).
    w2_p = jnp.zeros((lp, hidden), jnp.float32).at[:latent, :].set(w2)

    def prep(w, b):
        # bf16 weights for MXU / HBM bandwidth; f32 biases, pre-shaped (1, N).
        return w.astype(jnp.bfloat16), b.reshape(1, -1).astype(jnp.float32)

    return {
        "enc_fc1": prep(w1, b1),
        "enc_mulogvar": prep(jnp.concatenate([wmu_p, wlv_p], axis=1),
                             jnp.concatenate([bmu_p, blv_p], axis=0)),
        "dec_fc1": prep(w2_p, b2),
        "dec_out": prep(w3, b3),
    }


if __name__ == "__main__":
    B, C, H, W = 2, 4, 16, 16
    HIDDEN, LATENT = 256, 32

    root = jax.random.PRNGKey(0)
    k_param, k_x, k_eps = jax.random.split(root, 3)

    params = init_vae_params(k_param, C * H * W, HIDDEN, LATENT)
    x = jax.random.normal(k_x, (B, C, H, W), jnp.float32)

    fwd = jax.jit(functools.partial(vae_forward, latent=LATENT))
    recon, mu, logvar = fwd(params, x, k_eps)
    jax.block_until_ready((recon, mu, logvar))

    # Shape checks (VAE.forward returns (decode_(z), mu, logvar)).
    assert recon.shape == (B, C, H, W)
    assert mu.shape == (B, LATENT)
    assert logvar.shape == (B, LATENT)
    assert bool(jnp.all(jnp.isfinite(recon.astype(jnp.float32))))

    # Deterministic-path sanity check (mu/logvar don't depend on eps): pure-JAX reference
    # using the same (padded, bf16) weights.
    xf = x.reshape(B, C * H * W).astype(jnp.bfloat16)
    w1, b1 = params["enc_fc1"]
    wml, bml = params["enc_mulogvar"]
    lp = wml.shape[1] // 2
    h_ref = jnp.maximum(jnp.dot(xf, w1, preferred_element_type=jnp.float32) + b1, 0.0)
    ml_ref = jnp.dot(h_ref.astype(jnp.bfloat16), wml,
                     preferred_element_type=jnp.float32) + bml
    assert bool(jnp.allclose(mu, ml_ref[:, :LATENT], rtol=1e-2, atol=1e-2))
    assert bool(jnp.allclose(logvar, ml_ref[:, lp:lp + LATENT], rtol=1e-2, atol=1e-2))

    print("KERNEL_OK")
</pallas_src>

<mosaic_0001>
module attributes {stable_mosaic.version = 11 : i64} {
  func.func @_vae_fused_kernel(%arg0: i32, %arg1: memref<2x1024xbf16, #tpu.memory_space<vmem>>, %arg2: memref<2x128xf32, #tpu.memory_space<vmem>>, %arg3: memref<1024x256xbf16, #tpu.memory_space<vmem>>, %arg4: memref<1x256xf32, #tpu.memory_space<vmem>>, %arg5: memref<256x256xbf16, #tpu.memory_space<vmem>>, %arg6: memref<1x256xf32, #tpu.memory_space<vmem>>, %arg7: memref<128x256xbf16, #tpu.memory_space<vmem>>, %arg8: memref<1x256xf32, #tpu.memory_space<vmem>>, %arg9: memref<256x1024xbf16, #tpu.memory_space<vmem>>, %arg10: memref<1x1024xf32, #tpu.memory_space<vmem>>, %arg11: memref<2x1024xbf16, #tpu.memory_space<vmem>>, %arg12: memref<2x256xf32, #tpu.memory_space<vmem>>) attributes {dimension_semantics = [#tpu.dimension_semantics<parallel>], iteration_bounds = array<i64: 1>, scalar_prefetch = 0 : i64, scratch_operands = 0 : i64, tpu.core_type = #tpu.core_type<tc>, window_params = [{transform_indices = @transform_0, window_bounds = array<i64: 2, 1024>}, {transform_indices = @transform_1, window_bounds = array<i64: 2, 128>}, {pipeline_mode = #tpu.pipeline_mode<synchronous>, transform_indices = @transform_2, window_bounds = array<i64: 1024, 256>}, {pipeline_mode = #tpu.pipeline_mode<synchronous>, transform_indices = @transform_3, window_bounds = array<i64: 1, 256>}, {pipeline_mode = #tpu.pipeline_mode<synchronous>, transform_indices = @transform_4, window_bounds = array<i64: 256, 256>}, {pipeline_mode = #tpu.pipeline_mode<synchronous>, transform_indices = @transform_5, window_bounds = array<i64: 1, 256>}, {pipeline_mode = #tpu.pipeline_mode<synchronous>, transform_indices = @transform_6, window_bounds = array<i64: 128, 256>}, {pipeline_mode = #tpu.pipeline_mode<synchronous>, transform_indices = @transform_7, window_bounds = array<i64: 1, 256>}, {pipeline_mode = #tpu.pipeline_mode<synchronous>, transform_indices = @transform_8, window_bounds = array<i64: 256, 1024>}, {pipeline_mode = #tpu.pipeline_mode<synchronous>, transform_indices = @transform_9, window_bounds = array<i64: 1, 1024>}, {transform_indices = @transform_10, window_bounds = array<i64: 2, 1024>}, {transform_indices = @transform_11, window_bounds = array<i64: 2, 256>}]} {
    %c0 = arith.constant 0 : index
    %c0_0 = arith.constant 0 : index
    %0 = vector.load %arg1[%c0, %c0_0] : memref<2x1024xbf16, #tpu.memory_space<vmem>>, vector<2x1024xbf16>
    %c0_1 = arith.constant 0 : index
    %c0_2 = arith.constant 0 : index
    %1 = vector.load %arg3[%c0_1, %c0_2] : memref<1024x256xbf16, #tpu.memory_space<vmem>>, vector<1024x256xbf16>
    %cst = arith.constant dense<0.000000e+00> : vector<2x256xf32>
    %2 = tpu.matmul %0, %1, %cst {dimension_numbers = #tpu.dot_dimension_numbers<[1], [0], [0], [1], [0, 0, 1, 1], [], []>} : vector<2x1024xbf16>, vector<1024x256xbf16>, vector<2x256xf32> -> vector<2x256xf32>
    %c0_3 = arith.constant 0 : index
    %c0_4 = arith.constant 0 : index
    %3 = vector.load %arg4[%c0_3, %c0_4] : memref<1x256xf32, #tpu.memory_space<vmem>>, vector<1x256xf32>
    %4 = vector.broadcast %3 : vector<1x256xf32> to vector<2x256xf32>
    %5 = arith.addf %2, %4 : vector<2x256xf32>
    %cst_5 = arith.constant 0.000000e+00 : f32
    %6 = vector.broadcast %cst_5 : f32 to vector<2x256xf32>
    %7 = arith.maximumf %5, %6 : vector<2x256xf32>
    %8 = arith.truncf %7 : vector<2x256xf32> to vector<2x256xbf16>
    %c0_6 = arith.constant 0 : index
    %c0_7 = arith.constant 0 : index
    %9 = vector.load %arg5[%c0_6, %c0_7] : memref<256x256xbf16, #tpu.memory_space<vmem>>, vector<256x256xbf16>
    %cst_8 = arith.constant dense<0.000000e+00> : vector<2x256xf32>
    %10 = tpu.matmul %8, %9, %cst_8 {dimension_numbers = #tpu.dot_dimension_numbers<[1], [0], [0], [1], [0, 0, 1, 1], [], []>} : vector<2x256xbf16>, vector<256x256xbf16>, vector<2x256xf32> -> vector<2x256xf32>
    %c0_9 = arith.constant 0 : index
    %c0_10 = arith.constant 0 : index
    %11 = vector.load %arg6[%c0_9, %c0_10] : memref<1x256xf32, #tpu.memory_space<vmem>>, vector<1x256xf32>
    %12 = vector.broadcast %11 : vector<1x256xf32> to vector<2x256xf32>
    %13 = arith.addf %10, %12 : vector<2x256xf32>
    %c0_11 = arith.constant 0 : index
    %c0_12 = arith.constant 0 : index
    %14 = vector.load %arg12[%c0_11, %c0_12] : memref<2x256xf32, #tpu.memory_space<vmem>>, vector<2x256xf32>
    tpu.vector_store %arg12[%c0_11, %c0_12], %13 {strides = array<i32>} : memref<2x256xf32, #tpu.memory_space<vmem>>, vector<2x256xf32>,
    %15 = vector.extract_strided_slice %13 {offsets = [0, 0], sizes = [2, 128], strides = [1, 1]} : vector<2x256xf32> to vector<2x128xf32>
    %16 = vector.extract_strided_slice %13 {offsets = [0, 128], sizes = [2, 128], strides = [1, 1]} : vector<2x256xf32> to vector<2x128xf32>
    %cst_13 = arith.constant 5.000000e-01 : f32
    %17 = vector.broadcast %cst_13 : f32 to vector<2x128xf32>
    %18 = arith.mulf %17, %16 : vector<2x128xf32>
    %19 = math.exp %18 : vector<2x128xf32>
    %c0_14 = arith.constant 0 : index
    %c0_15 = arith.constant 0 : index
    %20 = vector.load %arg2[%c0_14, %c0_15] : memref<2x128xf32, #tpu.memory_space<vmem>>, vector<2x128xf32>
    %21 = arith.mulf %19, %20 : vector<2x128xf32>
    %22 = arith.addf %15, %21 : vector<2x128xf32>
    %23 = arith.truncf %22 : vector<2x128xf32> to vector<2x128xbf16>
    %c0_16 = arith.constant 0 : index
    %c0_17 = arith.constant 0 : index
    %24 = vector.load %arg7[%c0_16, %c0_17] : memref<128x256xbf16, #tpu.memory_space<vmem>>, vector<128x256xbf16>
    %cst_18 = arith.constant dense<0.000000e+00> : vector<2x256xf32>
    %25 = tpu.matmul %23, %24, %cst_18 {dimension_numbers = #tpu.dot_dimension_numbers<[1], [0], [0], [1], [0, 0, 1, 1], [], []>} : vector<2x128xbf16>, vector<128x256xbf16>, vector<2x256xf32> -> vector<2x256xf32>
    %c0_19 = arith.constant 0 : index
    %c0_20 = arith.constant 0 : index
    %26 = vector.load %arg8[%c0_19, %c0_20] : memref<1x256xf32, #tpu.memory_space<vmem>>, vector<1x256xf32>
    %27 = vector.broadcast %26 : vector<1x256xf32> to vector<2x256xf32>
    %28 = arith.addf %25, %27 : vector<2x256xf32>
    %cst_21 = arith.constant 0.000000e+00 : f32
    %29 = vector.broadcast %cst_21 : f32 to vector<2x256xf32>
    %30 = arith.maximumf %28, %29 : vector<2x256xf32>
    %31 = arith.truncf %30 : vector<2x256xf32> to vector<2x256xbf16>
    %c0_22 = arith.constant 0 : index
    %c0_23 = arith.constant 0 : index
    %32 = vector.load %arg9[%c0_22, %c0_23] : memref<256x1024xbf16, #tpu.memory_space<vmem>>, vector<256x1024xbf16>
    %cst_24 = arith.constant dense<0.000000e+00> : vector<2x1024xf32>
    %33 = tpu.matmul %31, %32, %cst_24 {dimension_numbers = #tpu.dot_dimension_numbers<[1], [0], [0], [1], [0, 0, 1, 1], [], []>} : vector<2x256xbf16>, vector<256x1024xbf16>, vector<2x1024xf32> -> vector<2x1024xf32>
    %c0_25 = arith.constant 0 : index
    %c0_26 = arith.constant 0 : index
    %34 = vector.load %arg10[%c0_25, %c0_26] : memref<1x1024xf32, #tpu.memory_space<vmem>>, vector<1x1024xf32>
    %35 = vector.broadcast %34 : vector<1x1024xf32> to vector<2x1024xf32>
    %36 = arith.addf %33, %35 : vector<2x1024xf32>
    %37 = arith.truncf %36 : vector<2x1024xf32> to vector<2x1024xbf16>
    %c0_27 = arith.constant 0 : index
    %c0_28 = arith.constant 0 : index
    %38 = vector.load %arg11[%c0_27, %c0_28] : memref<2x1024xbf16, #tpu.memory_space<vmem>>, vector<2x1024xbf16>
    tpu.vector_store %arg11[%c0_27, %c0_28], %37 {strides = array<i32>} : memref<2x1024xbf16, #tpu.memory_space<vmem>>, vector<2x1024xbf16>,
    return
  }
  func.func @transform_0(%arg0: i32) -> (i32, i32) {
    %c0_i32 = arith.constant 0 : i32
    %c0_i32_0 = arith.constant 0 : i32
    return %arg0, %c0_i32 : i32, i32
  }
  func.func @transform_1(%arg0: i32) -> (i32, i32) {
    %c0_i32 = arith.constant 0 : i32
    %c0_i32_0 = arith.constant 0 : i32
    return %arg0, %c0_i32 : i32, i32
  }
  func.func @transform_2(%arg0: i32) -> (i32, i32) {
    %c0_i32 = arith.constant 0 : i32
    %c0_i32_0 = arith.constant 0 : i32
    %c0_i32_1 = arith.constant 0 : i32
    return %c0_i32, %c0_i32_0 : i32, i32
  }
  func.func @transform_3(%arg0: i32) -> (i32, i32) {
    %c0_i32 = arith.constant 0 : i32
    %c0_i32_0 = arith.constant 0 : i32
    %c0_i32_1 = arith.constant 0 : i32
    return %c0_i32, %c0_i32_0 : i32, i32
  }
  func.func @transform_4(%arg0: i32) -> (i32, i32) {
    %c0_i32 = arith.constant 0 : i32
    %c0_i32_0 = arith.constant 0 : i32
    %c0_i32_1 = arith.constant 0 : i32
    return %c0_i32, %c0_i32_0 : i32, i32
  }
  func.func @transform_5(%arg0: i32) -> (i32, i32) {
    %c0_i32 = arith.constant 0 : i32
    %c0_i32_0 = arith.constant 0 : i32
    %c0_i32_1 = arith.constant 0 : i32
    return %c0_i32, %c0_i32_0 : i32, i32
  }
  func.func @transform_6(%arg0: i32) -> (i32, i32) {
    %c0_i32 = arith.constant 0 : i32
    %c0_i32_0 = arith.constant 0 : i32
    %c0_i32_1 = arith.constant 0 : i32
    return %c0_i32, %c0_i32_0 : i32, i32
  }
  func.func @transform_7(%arg0: i32) -> (i32, i32) {
    %c0_i32 = arith.constant 0 : i32
    %c0_i32_0 = arith.constant 0 : i32
    %c0_i32_1 = arith.constant 0 : i32
    return %c0_i32, %c0_i32_0 : i32, i32
  }
  func.func @transform_8(%arg0: i32) -> (i32, i32) {
    %c0_i32 = arith.constant 0 : i32
    %c0_i32_0 = arith.constant 0 : i32
    %c0_i32_1 = arith.constant 0 : i32
    return %c0_i32, %c0_i32_0 : i32, i32
  }
  func.func @transform_9(%arg0: i32) -> (i32, i32) {
    %c0_i32 = arith.constant 0 : i32
    %c0_i32_0 = arith.constant 0 : i32
    %c0_i32_1 = arith.constant 0 : i32
    return %c0_i32, %c0_i32_0 : i32, i32
  }
  func.func @transform_10(%arg0: i32) -> (i32, i32) {
    %c0_i32 = arith.constant 0 : i32
    %c0_i32_0 = arith.constant 0 : i32
    return %arg0, %c0_i32 : i32, i32
  }
  func.func @transform_11(%arg0: i32) -> (i32, i32) {
    %c0_i32 = arith.constant 0 : i32
    %c0_i32_0 = arith.constant 0 : i32
    return %arg0, %c0_i32 : i32, i32
  }
}

</mosaic_0001>

<bundles_post_ra>
// kernel: vae_forward.1
= control target key start
LH: loop header
LB: loop body
LE: loop exit
PB: predicated region body
PF: predicated region fallthrough
CT: control target
= control target key end

     0   :  { %17 = vsyncpa [#allocation3], 0  ;;  %s4502_s0 = inlined_call_operand.vmem [shape: bf16[2,1024], index: 0, kind: input, shape index: {}]   ;;  %s4503_s1 = inlined_call_operand.vmem [shape: f32[2,128], index: 1, kind: input, shape index: {}]   ;;  %s4504_s2 = inlined_call_operand.hbm [shape: bf16[1024,256], index: 2, kind: input, shape index: {}]   ;;  %s4505_s3 = inlined_call_operand.vmem [shape: f32[1,256], index: 3, kind: input, shape index: {}]   ;;  %s4506_s4 = inlined_call_operand.vmem [shape: bf16[256,256], index: 4, kind: input, shape index: {}]   ;;  %s4507_s5 = inlined_call_operand.vmem [shape: f32[1,256], index: 5, kind: input, shape index: {}]   ;;  %s4508_s6 = inlined_call_operand.hbm [shape: bf16[128,256], index: 6, kind: input, shape index: {}]   ;;  %s4509_s7 = inlined_call_operand.vmem [shape: f32[1,256], index: 7, kind: input, shape index: {}]   ;;  %s4510_s8 = inlined_call_operand.hbm [shape: bf16[256,1024], index: 8, kind: input, shape index: {}]   ;;  %s4511_s9 = inlined_call_operand.vmem [shape: f32[1,1024], index: 9, kind: input, shape index: {}]   ;;  %s4512_s10 = inlined_call_operand.vmem [shape: bf16[2,1024], index: 10, kind: output, shape index: {0}]   ;;  %s4513_s11 = inlined_call_operand.vmem [shape: f32[2,256], index: 11, kind: output, shape index: {1}]  }
   0x1   :  { %18 = vsyncpa [#allocation5], 0  ;;  %s46_s19 = sshll.u32 %s4508_s6, 4  ;;  %s4132_s20 = smov [#allocation4]   ;;  %s47_s19 = int_to_ptr.hbm [resolvable:$true] %s46_s19 }
   0x2   :  { %s48_s21 = sshll.u32 %s4132_s20, 4  ;;  %s27_s24 = sshll.u32 %s4504_s2, 4  ;;  %s49_s21 = int_to_ptr.vmem [resolvable:$true] %s48_s21  ;;  %s28_s24 = int_to_ptr.hbm [resolvable:$true] %s27_s24 }
   0x3   :  { %s4133_s25 = smov 128   ;;  %s4134_s26 = smov 8  }
   0x4   :  { %54 = dma.hbm_to_vmem [thread:$0]  %s47_s19, 2048, %s49_s21, [#allocation5], %s4133_s25, %s4133_s25, %s4134_s26  }
   0x5   :  { %s4135_s27 = smov [#allocation2]   ;;  %s61_s12 = sshll.u32 %s4510_s8, 4  ;;  %s62_s12 = int_to_ptr.hbm [resolvable:$true] %s61_s12 }
   0x6   :  { %s29_s28 = sshll.u32 %s4135_s27, 4  ;;  %s4136_s6 = smov [#allocation6]   ;;  %s30_s28 = int_to_ptr.vmem [resolvable:$true] %s29_s28 }
   0x7   :  { %35 = dma.hbm_to_vmem [thread:$0]  %s28_s24, 16384, %s30_s28, [#allocation3], %s4133_s25, %s4133_s25, %s4134_s26  }
   0x8   :  { %s63_s13 = sshll.u32 %s4136_s6, 4  ;;  %s4137_s14 = smov 512   ;;  %s64_s13 = int_to_ptr.vmem [resolvable:$true] %s63_s13 }
   0x9   :  { %s4138_s15 = smov 32  }
   0xa   :  { %69 = dma.hbm_to_vmem [thread:$0]  %s62_s12, 16384, %s64_s13, [#allocation5], %s4137_s14, %s4137_s14, %s4138_s15  }
   0xb   :  { %4128 = dma.done.wait [#allocation3], 16384  }
   0xc   :  { %4129 = vsyncadd [#allocation3], 4294950912 }
   0xd   :  { %4130 = dma.done.wait [#allocation5], 18432  }
   0xe   :  { %4131 = vsyncadd [#allocation5], 4294948864  ;;  %v2585_v0 = vld [vmem:[#allocation2 + $0x70] sm:$0xf]  ;;  %v3758_v1 = vld [vmem:[#allocation2 + $0x74] sm:$0xf0] }
   0xf   :  { %v2649_v2 = vld [vmem:[#allocation2 + $0xf0] sm:$0xf]  ;;  %v2586_v3 = vor.u32 %v3758_v1, %v2585_v0  ;;  %v3774_v4 = vld [vmem:[#allocation2 + $0xf4] sm:$0xf0]  ;;  %v2577_v11 = vld [vmem:[#allocation2 + $0x60] sm:$0xf] }
  0x10   :  { %v2713_v5 = vld [vmem:[#allocation2 + $0x170] sm:$0xf]  ;;  %v3790_v6 = vld [vmem:[#allocation2 + $0x174] sm:$0xf0]  ;;  %v2650_v7 = vor.u32 %v3774_v4, %v2649_v2  ;;  %v3756_v13 = vld [vmem:[#allocation2 + $0x64] sm:$0xf0] }
  0x11   :  { %v2714_v8 = vor.u32 %v3790_v6, %v2713_v5  ;;  %v2777_v9 = vld [vmem:[#allocation2 + $0x1f0] sm:$0xf]  ;;  %v3806_v10 = vld [vmem:[#allocation2 + $0x1f4] sm:$0xf0]  ;;  %877 = vmatpush.bf16.msra.mxu0 %v2586_v3  ;;  %v2641_v14 = vld [vmem:[#allocation2 + $0xe0] sm:$0xf]  ;;  %v2578_v16 = vor.u32 %v3756_v13, %v2577_v11 }
  0x12   :  { %v2778_v12 = vor.u32 %v3806_v10, %v2777_v9  ;;  %v3772_v15 = vld [vmem:[#allocation2 + $0xe4] sm:$0xf0]  ;;  %890 = vmatpush.bf16.msra.mxu1 %v2650_v7  ;;  %v2705_v18 = vld [vmem:[#allocation2 + $0x160] sm:$0xf]  ;;  %v2569_v23 = vld [vmem:[#allocation2 + $0x50] sm:$0xf] }
  0x13   :  { %903 = vmatpush.bf16.msra.mxu2 %v2714_v8  ;;  %v2642_v17 = vor.u32 %v3772_v15, %v2641_v14  ;;  %v3788_v19 = vld [vmem:[#allocation2 + $0x164] sm:$0xf0]  ;;  %v2769_v20 = vld [vmem:[#allocation2 + $0x1e0] sm:$0xf]  ;;  %v3754_v24 = vld [vmem:[#allocation2 + $0x54] sm:$0xf0] }
  0x14   :  { %916 = vmatpush.bf16.msra.mxu3 %v2778_v12  ;;  %v2706_v21 = vor.u32 %v3788_v19, %v2705_v18  ;;  %v3804_v22 = vld [vmem:[#allocation2 + $0x1e4] sm:$0xf0]  ;;  %v2633_v26 = vld [vmem:[#allocation2 + $0xd0] sm:$0xf]  ;;  %v3770_v27 = vld [vmem:[#allocation2 + $0xd4] sm:$0xf0]  ;;  %v2570_v29 = vor.u32 %v3754_v24, %v2569_v23 }
  0x15   :  { %v2770_v25 = vor.u32 %v3804_v22, %v2769_v20  ;;  %v2697_v28 = vld [vmem:[#allocation2 + $0x150] sm:$0xf]  ;;  %878 = vmatpush.bf16.msra.mxu0 %v2578_v16  ;;  %v3786_v30 = vld [vmem:[#allocation2 + $0x154] sm:$0xf0]  ;;  %v2634_v33 = vor.u32 %v3770_v27, %v2633_v26  ;;  %v2561_v35 = vld [vmem:[#allocation2 + $0x40] sm:$0xf] }
  0x16   :  { %v2761_v31 = vld [vmem:[#allocation2 + $0x1d0] sm:$0xf]  ;;  %v3802_v32 = vld [vmem:[#allocation2 + $0x1d4] sm:$0xf0]  ;;  %891 = vmatpush.bf16.msra.mxu1 %v2642_v17  ;;  %v2698_v34 = vor.u32 %v3786_v30, %v2697_v28  ;;  %v3752_v36 = vld [vmem:[#allocation2 + $0x44] sm:$0xf0] }
  0x17   :  { %904 = vmatpush.bf16.msra.mxu2 %v2706_v21  ;;  %v2625_v37 = vld [vmem:[#allocation2 + $0xc0] sm:$0xf]  ;;  %v2762_v38 = vor.u32 %v3802_v32, %v2761_v31  ;;  %v3768_v39 = vld [vmem:[#allocation2 + $0xc4] sm:$0xf0]  ;;  %v2562_v44 = vor.u32 %v3752_v36, %v2561_v35  ;;  %v2553_v47 = vld [vmem:[#allocation2 + $0x30] sm:$0xf] }
  0x18   :  { %917 = vmatpush.bf16.msra.mxu3 %v2770_v25  ;;  %v2689_v40 = vld [vmem:[#allocation2 + $0x140] sm:$0xf]  ;;  %v3784_v41 = vld [vmem:[#allocation2 + $0x144] sm:$0xf0]  ;;  %v2626_v45 = vor.u32 %v3768_v39, %v2625_v37  ;;  %v3750_v48 = vld [vmem:[#allocation2 + $0x34] sm:$0xf0] }
  0x19   :  { %v2753_v42 = vld [vmem:[#allocation2 + $0x1c0] sm:$0xf]  ;;  %v3800_v43 = vld [vmem:[#allocation2 + $0x1c4] sm:$0xf0]  ;;  %879 = vmatpush.bf16.msra.mxu0 %v2570_v29  ;;  %v2690_v46 = vor.u32 %v3784_v41, %v2689_v40  ;;  %v2617_v49 = vld [vmem:[#allocation2 + $0xb0] sm:$0xf]  ;;  %v2554_v56 = vor.u32 %v3750_v48, %v2553_v47 }
  0x1a   :  { %892 = vmatpush.bf16.msra.mxu1 %v2634_v33  ;;  %v2754_v50 = vor.u32 %v3800_v43, %v2753_v42  ;;  %v3766_v51 = vld [vmem:[#allocation2 + $0xb4] sm:$0xf0]  ;;  %v2681_v52 = vld [vmem:[#allocation2 + $0x130] sm:$0xf]  ;;  %v2545_v59 = vld [vmem:[#allocation2 + $0x20] sm:$0xf] }
  0x1b   :  { %905 = vmatpush.bf16.msra.mxu2 %v2698_v34  ;;  %v3782_v53 = vld [vmem:[#allocation2 + $0x134] sm:$0xf0]  ;;  %v2745_v54 = vld [vmem:[#allocation2 + $0x1b0] sm:$0xf]  ;;  %v2618_v57 = vor.u32 %v3766_v51, %v2617_v49  ;;  %v3748_v60 = vld [vmem:[#allocation2 + $0x24] sm:$0xf0] }
  0x1c   :  { %918 = vmatpush.bf16.msra.mxu3 %v2762_v38  ;;  %v3798_v55 = vld [vmem:[#allocation2 + $0x1b4] sm:$0xf0]  ;;  %v2682_v58 = vor.u32 %v3782_v53, %v2681_v52  ;;  %v2609_v61 = vld [vmem:[#allocation2 + $0xa0] sm:$0xf]  ;;  %v3764_v63 = vld [vmem:[#allocation2 + $0xa4] sm:$0xf0]  ;;  %v2546_v4 = vor.u32 %v3748_v60, %v2545_v59 }
  0x1d   :  { %880 = vmatpush.bf16.msra.mxu0 %v2562_v44  ;;  %v2746_v62 = vor.u32 %v3798_v55, %v2745_v54  ;;  %v2673_v0 = vld [vmem:[#allocation2 + $0x120] sm:$0xf]  ;;  %v3780_v1 = vld [vmem:[#allocation2 + $0x124] sm:$0xf0]  ;;  %v2610_v5 = vor.u32 %v3764_v63, %v2609_v61  ;;  %v2537_v7 = vld [vmem:[#allocation2 + $0x10] sm:$0xf] }
  0x1e   :  { %893 = vmatpush.bf16.msra.mxu1 %v2626_v45  ;;  %v2737_v2 = vld [vmem:[#allocation2 + $0x1a0] sm:$0xf]  ;;  %v3796_v3 = vld [vmem:[#allocation2 + $0x1a4] sm:$0xf0]  ;;  %v2674_v6 = vor.u32 %v3780_v1, %v2673_v0  ;;  %v3746_v8 = vld [vmem:[#allocation2 + $0x14] sm:$0xf0] }
  0x1f   :  { %906 = vmatpush.bf16.msra.mxu2 %v2690_v46  ;;  %v2601_v9 = vld [vmem:[#allocation2 + $0x90] sm:$0xf]  ;;  %v2738_v10 = vor.u32 %v3796_v3, %v2737_v2  ;;  %v3762_v11 = vld [vmem:[#allocation2 + $0x94] sm:$0xf0]  ;;  %v2538_v16 = vor.u32 %v3746_v8, %v2537_v7  ;;  %v2529_v17 = vld [vmem:[#allocation2] sm:$0xf] }
  0x20   :  { %919 = vmatpush.bf16.msra.mxu3 %v2754_v50  ;;  %v2665_v12 = vld [vmem:[#allocation2 + $0x110] sm:$0xf]  ;;  %v3778_v13 = vld [vmem:[#allocation2 + $0x114] sm:$0xf0]  ;;  %v3744_v18 = vld [vmem:[#allocation2 + $0x4] sm:$0xf0]  ;;  %v2602_v19 = vor.u32 %v3762_v11, %v2601_v9 }
  0x21   :  { %881 = vmatpush.bf16.msra.mxu0 %v2554_v56  ;;  %v2729_v14 = vld [vmem:[#allocation2 + $0x190] sm:$0xf]  ;;  %v3794_v15 = vld [vmem:[#allocation2 + $0x194] sm:$0xf0]  ;;  %v2666_v20 = vor.u32 %v3778_v13, %v2665_v12  ;;  %v2593_v21 = vld [vmem:[#allocation2 + $0x80] sm:$0xf]  ;;  %v2530_v31 = vor.u32 %v3744_v18, %v2529_v17 }
  0x22   :  { %894 = vmatpush.bf16.msra.mxu1 %v2618_v57  ;;  %v3760_v22 = vld [vmem:[#allocation2 + $0x84] sm:$0xf0]  ;;  %v2657_v23 = vld [vmem:[#allocation2 + $0x100] sm:$0xf]  ;;  %v2730_v24 = vor.u32 %v3794_v15, %v2729_v14  ;;  %v2841_v28 = vld [vmem:[#allocation2 + $0x270] sm:$0xf] }
  0x23   :  { %907 = vmatpush.bf16.msra.mxu2 %v2682_v58  ;;  %v3776_v25 = vld [vmem:[#allocation2 + $0x104] sm:$0xf0]  ;;  %v2721_v26 = vld [vmem:[#allocation2 + $0x180] sm:$0xf]  ;;  %v3822_v29 = vld [vmem:[#allocation2 + $0x274] sm:$0xf0]  ;;  %v2594_v35 = vor.u32 %v3760_v22, %v2593_v21 }
  0x24   :  { %920 = vmatpush.bf16.msra.mxu3 %v2746_v62  ;;  %v3792_v27 = vld [vmem:[#allocation2 + $0x184] sm:$0xf0]  ;;  %v2905_v30 = vld [vmem:[#allocation2 + $0x2f0] sm:$0xf]  ;;  %v3838_v32 = vld [vmem:[#allocation2 + $0x2f4] sm:$0xf0]  ;;  %v2658_v36 = vor.u32 %v3776_v25, %v2657_v23  ;;  %v2842_v40 = vor.u32 %v3822_v29, %v2841_v28 }
  0x25   :  { %882 = vmatpush.bf16.msra.mxu0 %v2546_v4  ;;  %v2969_v33 = vld [vmem:[#allocation2 + $0x370] sm:$0xf]  ;;  %v3854_v34 = vld [vmem:[#allocation2 + $0x374] sm:$0xf0]  ;;  %v2722_v39 = vor.u32 %v3792_v27, %v2721_v26  ;;  %v2906_v41 = vor.u32 %v3838_v32, %v2905_v30  ;;  %v2833_v43 = vld [vmem:[#allocation2 + $0x260] sm:$0xf] }
  0x26   :  { %895 = vmatpush.bf16.msra.mxu1 %v2610_v5  ;;  %v3033_v37 = vld [vmem:[#allocation2 + $0x3f0] sm:$0xf]  ;;  %v3870_v38 = vld [vmem:[#allocation2 + $0x3f4] sm:$0xf0]  ;;  %v2970_v42 = vor.u32 %v3854_v34, %v2969_v33  ;;  %v3820_v44 = vld [vmem:[#allocation2 + $0x264] sm:$0xf0] }
  0x27   :  { %908 = vmatpush.bf16.msra.mxu2 %v2674_v6  ;;  %v2897_v45 = vld [vmem:[#allocation2 + $0x2e0] sm:$0xf]  ;;  %v3034_v46 = vor.u32 %v3870_v38, %v3033_v37  ;;  %v3836_v47 = vld [vmem:[#allocation2 + $0x2e4] sm:$0xf0]  ;;  %v84_v52 = vld [vmem:[%s4502_s0] sm:$0xff]  ;;  %v2834_v53 = vor.u32 %v3820_v44, %v2833_v43  ;;  %vm1342_vm0 = vcmask 1041408  }
  0x28   :  { %921 = vmatpush.bf16.msra.mxu3 %v2738_v10  ;;  %v2961_v48 = vld [vmem:[#allocation2 + $0x360] sm:$0xf]  ;;  %v3852_v49 = vld [vmem:[#allocation2 + $0x364] sm:$0xf0]  ;;  %220 = vst [vmem:[#allocation1] ss:$9 sm:$0xff] %v84_v52  ;;  %v2898_v54 = vor.u32 %v3836_v47, %v2897_v45 }
  0x29   :  { %883 = vmatpush.bf16.msra.mxu0 %v2538_v16  ;;  %v3025_v50 = vld [vmem:[#allocation2 + $0x3e0] sm:$0xf]  ;;  %v3868_v51 = vld [vmem:[#allocation2 + $0x3e4] sm:$0xf0]  ;;  %v2962_v55 = vor.u32 %v3852_v49, %v2961_v48  ;;  %v2825_v56 = vld [vmem:[#allocation2 + $0x250] sm:$0xf] }
  0x2a   :  { %896 = vmatpush.bf16.msra.mxu1 %v2602_v19  ;;  %v3818_v57 = vld [vmem:[#allocation2 + $0x254] sm:$0xf0]  ;;  %v2889_v58 = vld [vmem:[#allocation2 + $0x2d0] sm:$0xf]  ;;  %v3026_v59 = vor.u32 %v3868_v51, %v3025_v50  ;;  %v2817_v2 = vld [vmem:[#allocation2 + $0x240] sm:$0xf] }
  0x2b   :  { %909 = vmatpush.bf16.msra.mxu2 %v2666_v20  ;;  %v3834_v60 = vld [vmem:[#allocation2 + $0x2d4] sm:$0xf0]  ;;  %v2953_v61 = vld [vmem:[#allocation2 + $0x350] sm:$0xf]  ;;  %v2826_v1 = vor.u32 %v3818_v57, %v2825_v56  ;;  %v3816_v5 = vld [vmem:[#allocation2 + $0x244] sm:$0xf0] }
  0x2c   :  { %922 = vmatpush.bf16.msra.mxu3 %v2730_v24  ;;  %v3850_v62 = vld [vmem:[#allocation2 + $0x354] sm:$0xf0]  ;;  %v3017_v63 = vld [vmem:[#allocation2 + $0x3d0] sm:$0xf]  ;;  %v2890_v3 = vor.u32 %v3834_v60, %v2889_v58  ;;  %v2881_v6 = vld [vmem:[#allocation2 + $0x2c0] sm:$0xf]  ;;  %v2818_v15 = vor.u32 %v3816_v5, %v2817_v2 }
  0x2d   :  { %884 = vmatpush.bf16.msra.mxu0 %v2530_v31  ;;  %v3866_v0 = vld [vmem:[#allocation2 + $0x3d4] sm:$0xf0]  ;;  %v2954_v4 = vor.u32 %v3850_v62, %v2953_v61  ;;  %v3832_v7 = vld [vmem:[#allocation2 + $0x2c4] sm:$0xf0]  ;;  %v2945_v9 = vld [vmem:[#allocation2 + $0x340] sm:$0xf] }
  0x2e   :  { %897 = vmatpush.bf16.msra.mxu1 %v2594_v35  ;;  %v3018_v8 = vor.u32 %v3866_v0, %v3017_v63  ;;  %v3848_v10 = vld [vmem:[#allocation2 + $0x344] sm:$0xf0]  ;;  %v3009_v11 = vld [vmem:[#allocation2 + $0x3c0] sm:$0xf]  ;;  %v2882_v18 = vor.u32 %v3832_v7, %v2881_v6  ;;  %v2809_v20 = vld [vmem:[#allocation2 + $0x230] sm:$0xf] }
  0x2f   :  { %910 = vmatpush.bf16.msra.mxu2 %v2658_v36  ;;  %v3864_v12 = vld [vmem:[#allocation2 + $0x3c4] sm:$0xf0]  ;;  %v4213_v14 = vld [vmem:[#allocation1] sm:$0xff]  ;;  %v2946_v19 = vor.u32 %v3848_v10, %v2945_v9  ;;  %v2873_v22 = vld [vmem:[#allocation2 + $0x2b0] sm:$0xf]  ;;  %vm2498_vm1 = vcmask 1042434  }
  0x30   :  { %923 = vmatpush.bf16.msra.mxu3 %v2722_v39  ;;  %v4211_v13 = vld [vmem:[#allocation1 + $0x12] sm:$0xff]  ;;  %v4216_v16 = vld [vmem:[#allocation1 + $0x1b] sm:$0xff]  ;;  %v4218_v17 = vld [vmem:[#allocation1 + $0x9] sm:$0xff]  ;;  %v3010_v23 = vor.u32 %v3864_v12, %v3009_v11  ;;  %885 = vmatmul.bf16.vlgmr.msra.gmra.mxu0 %v4213_v14  ;;  %vm2494_vm2 = vcmask 1040384   ;;  %vm2503_vm3 = vcmask 1044484   ;;  %vm2507_vm4 = vcmask 1046534  }
  0x31   :  { %929 = vmatpush.bf16.msrb.mxu0 %v2842_v40  ;;  %v3814_v21 = vld [vmem:[#allocation2 + $0x234] sm:$0xf0]  ;;  %v2937_v25 = vld [vmem:[#allocation2 + $0x330] sm:$0xf]  ;;  %898 = vmatmul.bf16.vlgmr.msra.gmra.mxu1 %v4218_v17  ;;  %v2801_v32 = vld [vmem:[#allocation2 + $0x220] sm:$0xf] }
  0x32   :  { %942 = vmatpush.bf16.msrb.mxu1 %v2906_v41  ;;  %911 = vmatmul.bf16.vlgmr.msra.gmra.mxu2 %v4211_v13  ;;  %v3830_v24 = vld [vmem:[#allocation2 + $0x2b4] sm:$0xf0]  ;;  %v3001_v27 = vld [vmem:[#allocation2 + $0x3b0] sm:$0xf]  ;;  %v2810_v29 = vor.u32 %v3814_v21, %v2809_v20  ;;  %v3812_v33 = vld [vmem:[#allocation2 + $0x224] sm:$0xf0] }
  0x33   :  { %955 = vmatpush.bf16.msrb.mxu2 %v2970_v42  ;;  %v3846_v26 = vld [vmem:[#allocation2 + $0x334] sm:$0xf0]  ;;  %924 = vmatmul.bf16.vlgmr.msra.gmra.mxu3 %v4216_v16  ;;  %v2874_v30 = vor.u32 %v3830_v24, %v2873_v22  ;;  %v2865_v34 = vld [vmem:[#allocation2 + $0x2a0] sm:$0xf]  ;;  %v3828_v36 = vld [vmem:[#allocation2 + $0x2a4] sm:$0xf0]  ;;  %v2802_v41 = vor.u32 %v3812_v33, %v2801_v32 }
  0x34   :  { %968 = vmatpush.bf16.msrb.mxu3 %v3034_v46  ;;  %v3862_v28 = vld [vmem:[#allocation2 + $0x3b4] sm:$0xf0]  ;;  %v2938_v31 = vor.u32 %v3846_v26, %v2937_v25  ;;  %v2929_v37 = vld [vmem:[#allocation2 + $0x320] sm:$0xf]  ;;  %v3844_v38 = vld [vmem:[#allocation2 + $0x324] sm:$0xf0]  ;;  %v2866_v42 = vor.u32 %v3828_v36, %v2865_v34 }
  0x35   :  { %930 = vmatpush.bf16.msrb.mxu0 %v2834_v53  ;;  %v3002_v35 = vor.u32 %v3862_v28, %v3001_v27  ;;  %v2993_v39 = vld [vmem:[#allocation2 + $0x3a0] sm:$0xf]  ;;  %v3860_v40 = vld [vmem:[#allocation2 + $0x3a4] sm:$0xf0]  ;;  %v2930_v43 = vor.u32 %v3844_v38, %v2929_v37  ;;  %v2793_v44 = vld [vmem:[#allocation2 + $0x210] sm:$0xf] }
  0x36   :  { %943 = vmatpush.bf16.msrb.mxu1 %v2898_v54  ;;  %v3810_v45 = vld [vmem:[#allocation2 + $0x214] sm:$0xf0]  ;;  %v2857_v46 = vld [vmem:[#allocation2 + $0x290] sm:$0xf]  ;;  %v2994_v47 = vor.u32 %v3860_v40, %v2993_v39  ;;  %v2785_v54 = vld [vmem:[#allocation2 + $0x200] sm:$0xf] }
  0x37   :  { %956 = vmatpush.bf16.msrb.mxu2 %v2962_v55  ;;  %v3826_v48 = vld [vmem:[#allocation2 + $0x294] sm:$0xf0]  ;;  %v2921_v49 = vld [vmem:[#allocation2 + $0x310] sm:$0xf]  ;;  %v2794_v53 = vor.u32 %v3810_v45, %v2793_v44  ;;  %v3808_v55 = vld [vmem:[#allocation2 + $0x204] sm:$0xf0] }
  0x38   :  { %969 = vmatpush.bf16.msrb.mxu3 %v3026_v59  ;;  %v3842_v50 = vld [vmem:[#allocation2 + $0x314] sm:$0xf0]  ;;  %v2985_v51 = vld [vmem:[#allocation2 + $0x390] sm:$0xf]  ;;  %v2858_v56 = vor.u32 %v3826_v48, %v2857_v46  ;;  %v2849_v58 = vld [vmem:[#allocation2 + $0x280] sm:$0xf] }
  0x39   :  { %931 = vmatpush.bf16.msrb.mxu0 %v2826_v1  ;;  %v3858_v52 = vld [vmem:[#allocation2 + $0x394] sm:$0xf0]  ;;  %v2922_v57 = vor.u32 %v3842_v50, %v2921_v49  ;;  %v3824_v59 = vld [vmem:[#allocation2 + $0x284] sm:$0xf0]  ;;  %v2913_v60 = vld [vmem:[#allocation2 + $0x300] sm:$0xf] }
  0x3a   :  { %944 = vmatpush.bf16.msrb.mxu1 %v2890_v3  ;;  %v2986_v61 = vor.u32 %v3858_v52, %v2985_v51  ;;  %v3840_v62 = vld [vmem:[#allocation2 + $0x304] sm:$0xf0]  ;;  %v2977_v63 = vld [vmem:[#allocation2 + $0x380] sm:$0xf]  ;;  %v3757_v1 = vld [vmem:[#allocation2 + $0x74] sm:$0xf] }
  0x3b   :  { %957 = vmatpush.bf16.msrb.mxu2 %v2954_v4  ;;  %v3856_v0 = vld [vmem:[#allocation2 + $0x384] sm:$0xf0]  ;;  %v2587_v2 = vld [vmem:[#allocation2 + $0x78] sm:$0xf0]  ;;  %v3773_v3 = vld [vmem:[#allocation2 + $0xf4] sm:$0xf]  ;;  %v2786_v4 = vor.u32 %v3808_v55, %v2785_v54  ;;  %v2914_v9 = vor.u32 %v3840_v62, %v2913_v60 }
  0x3c   :  { %970 = vmatpush.bf16.msrb.mxu3 %v3018_v8  ;;  %v2651_v5 = vld [vmem:[#allocation2 + $0xf8] sm:$0xf0]  ;;  %v3789_v6 = vld [vmem:[#allocation2 + $0x174] sm:$0xf]  ;;  %v2850_v8 = vor.u32 %v3824_v59, %v2849_v58  ;;  %v2978_v12 = vor.u32 %v3856_v0, %v2977_v63  ;;  %v3755_v20 = vld [vmem:[#allocation2 + $0x64] sm:$0xf] }
  0x3d   :  { %932 = vmatpush.bf16.msrb.mxu0 %v2818_v15  ;;  %v2715_v7 = vld [vmem:[#allocation2 + $0x178] sm:$0xf0]  ;;  %v3805_v10 = vld [vmem:[#allocation2 + $0x1f4] sm:$0xf]  ;;  %v2590_v15 = vor.u32 %v3757_v1, %v2587_v2  ;;  %v2579_v21 = vld [vmem:[#allocation2 + $0x68] sm:$0xf0] }
  0x3e   :  { %945 = vmatpush.bf16.msrb.mxu1 %v2882_v18  ;;  %v2779_v11 = vld [vmem:[#allocation2 + $0x1f8] sm:$0xf0]  ;;  %v2654_v18 = vor.u32 %v3773_v3, %v2651_v5  ;;  %v3771_v22 = vld [vmem:[#allocation2 + $0xe4] sm:$0xf]  ;;  %v2643_v24 = vld [vmem:[#allocation2 + $0xe8] sm:$0xf0]  ;;  %v2582_v32 = vor.u32 %v3755_v20, %v2579_v21 }
  0x3f   :  { %958 = vmatpush.bf16.msrb.mxu2 %v2946_v19  ;;  %v2718_v19 = vor.u32 %v3789_v6, %v2715_v7  ;;  %v3787_v25 = vld [vmem:[#allocation2 + $0x164] sm:$0xf]  ;;  %v2707_v26 = vld [vmem:[#allocation2 + $0x168] sm:$0xf0]  ;;  %v2646_v34 = vor.u32 %v3771_v22, %v2643_v24  ;;  %v3753_v36 = vld [vmem:[#allocation2 + $0x54] sm:$0xf] }
  0x40   :  { %971 = vmatpush.bf16.msrb.mxu3 %v3010_v23  ;;  %v2782_v23 = vor.u32 %v3805_v10, %v2779_v11  ;;  %v4223_v27 = vld [vmem:[#allocation1 + $0x36] sm:$0xff]  ;;  %v3803_v28 = vld [vmem:[#allocation2 + $0x1e4] sm:$0xf]  ;;  %v2571_v37 = vld [vmem:[#allocation2 + $0x58] sm:$0xf0]  ;;  %vm2511_vm5 = vcmask 1045508  }
  0x41   :  { %933 = vmatpush.bf16.msrb.mxu0 %v2810_v29  ;;  %v2771_v29 = vld [vmem:[#allocation2 + $0x1e8] sm:$0xf0]  ;;  %v3769_v38 = vld [vmem:[#allocation2 + $0xd4] sm:$0xf]  ;;  %v2635_v40 = vld [vmem:[#allocation2 + $0xd8] sm:$0xf0]  ;;  %v2574_v45 = vor.u32 %v3753_v36, %v2571_v37 }
  0x42   :  { %946 = vmatpush.bf16.msrb.mxu1 %v2874_v30  ;;  %v4225_v30 = vld [vmem:[#allocation1 + $0x24] sm:$0xff]  ;;  %v4229_v33 = vld [vmem:[#allocation1 + $0x2d] sm:$0xff]  ;;  %v2774_v39 = vor.u32 %v3803_v28, %v2771_v29  ;;  %v2638_v46 = vor.u32 %v3769_v38, %v2635_v40  ;;  %v3749_v60 = vld [vmem:[#allocation2 + $0x34] sm:$0xf]  ;;  %vm2513_vm6 = vcmask 1043456  }
  0x43   :  { %959 = vmatpush.bf16.msrb.mxu2 %v2938_v31  ;;  %v4227_v31 = vld [vmem:[#allocation1 + $0x3f] sm:$0xff]  ;;  %v3751_v48 = vld [vmem:[#allocation2 + $0x44] sm:$0xf]  ;;  %v2563_v49 = vld [vmem:[#allocation2 + $0x48] sm:$0xf0] }
  0x44   :  { %972 = vmatpush.bf16.msrb.mxu3 %v3002_v35  ;;  %v2710_v35 = vor.u32 %v3787_v25, %v2707_v26  ;;  %v2763_v44 = vld [vmem:[#allocation2 + $0x1d8] sm:$0xf0]  ;;  %v3767_v50 = vld [vmem:[#allocation2 + $0xc4] sm:$0xf]  ;;  %v2627_v52 = vld [vmem:[#allocation2 + $0xc8] sm:$0xf0] }
  0x45   :  { %934 = vmatpush.bf16.msrb.mxu0 %v2802_v41  ;;  %v3785_v41 = vld [vmem:[#allocation2 + $0x154] sm:$0xf]  ;;  %v2691_v54 = vld [vmem:[#allocation2 + $0x148] sm:$0xf0]  ;;  %v3799_v55 = vld [vmem:[#allocation2 + $0x1c4] sm:$0xf]  ;;  %v2630_v58 = vor.u32 %v3767_v50, %v2627_v52 }
  0x46   :  { %947 = vmatpush.bf16.msrb.mxu1 %v2866_v42  ;;  %v2699_v42 = vld [vmem:[#allocation2 + $0x158] sm:$0xf0]  ;;  %v3765_v62 = vld [vmem:[#allocation2 + $0xb4] sm:$0xf]  ;;  %v3763_v10 = vld [vmem:[#allocation2 + $0xa4] sm:$0xf] }
  0x47   :  { %960 = vmatpush.bf16.msrb.mxu2 %v2930_v43  ;;  %v3801_v43 = vld [vmem:[#allocation2 + $0x1d4] sm:$0xf]  ;;  %v2619_v0 = vld [vmem:[#allocation2 + $0xb8] sm:$0xf0]  ;;  %v2739_v20 = vld [vmem:[#allocation2 + $0x1a8] sm:$0xf0] }
  0x48   :  { %973 = vmatpush.bf16.msrb.mxu3 %v2994_v47  ;;  %v2702_v47 = vor.u32 %v3785_v41, %v2699_v42  ;;  %v2766_v51 = vor.u32 %v3801_v43, %v2763_v44  ;;  %v3781_v1 = vld [vmem:[#allocation2 + $0x134] sm:$0xf]  ;;  %v2683_v2 = vld [vmem:[#allocation2 + $0x138] sm:$0xf0]  ;;  %v2622_v6 = vor.u32 %v3765_v62, %v2619_v0  ;;  %v3743_v38 = vld [vmem:[#allocation2 + $0x4] sm:$0xf] }
  0x49   :  { %935 = vmatpush.bf16.msrb.mxu0 %v2794_v53  ;;  %v3783_v53 = vld [vmem:[#allocation2 + $0x144] sm:$0xf]  ;;  %v3797_v3 = vld [vmem:[#allocation2 + $0x1b4] sm:$0xf]  ;;  %v2686_v7 = vor.u32 %v3781_v1, %v2683_v2  ;;  %v2539_v25 = vld [vmem:[#allocation2 + $0x18] sm:$0xf0] }
  0x4a   :  { %948 = vmatpush.bf16.msrb.mxu1 %v2858_v56  ;;  %v2755_v56 = vld [vmem:[#allocation2 + $0x1c8] sm:$0xf0]  ;;  %v2694_v59 = vor.u32 %v3783_v53, %v2691_v54  ;;  %v3745_v24 = vld [vmem:[#allocation2 + $0x14] sm:$0xf]  ;;  %v2603_v29 = vld [vmem:[#allocation2 + $0x98] sm:$0xf0] }
  0x4b   :  { %961 = vmatpush.bf16.msrb.mxu2 %v2922_v57  ;;  %v2566_v57 = vor.u32 %v3751_v48, %v2563_v49  ;;  %v2758_v63 = vor.u32 %v3799_v55, %v2755_v56  ;;  %v3761_v26 = vld [vmem:[#allocation2 + $0x94] sm:$0xf]  ;;  %v2731_v36 = vld [vmem:[#allocation2 + $0x198] sm:$0xf0]  ;;  %v2542_v37 = vor.u32 %v3745_v24, %v2539_v25  ;;  %v3759_v42 = vld [vmem:[#allocation2 + $0x84] sm:$0xf] }
  0x4c   :  { %974 = vmatpush.bf16.msrb.mxu3 %v2986_v61  ;;  %v2555_v61 = vld [vmem:[#allocation2 + $0x38] sm:$0xf0]  ;;  %v2606_v40 = vor.u32 %v3761_v26, %v2603_v29  ;;  %v2595_v43 = vld [vmem:[#allocation2 + $0x88] sm:$0xf0]  ;;  %v3775_v44 = vld [vmem:[#allocation2 + $0x104] sm:$0xf] }
  0x4d   :  { %936 = vmatpush.bf16.msrb.mxu0 %v2786_v4  ;;  %v2747_v4 = vld [vmem:[#allocation2 + $0x1b8] sm:$0xf0]  ;;  %v2558_v5 = vor.u32 %v3749_v60, %v2555_v61  ;;  %v2723_v48 = vld [vmem:[#allocation2 + $0x188] sm:$0xf0]  ;;  %v3821_v49 = vld [vmem:[#allocation2 + $0x274] sm:$0xf]  ;;  %v2598_v56 = vor.u32 %v3759_v42, %v2595_v43 }
  0x4e   :  { %949 = vmatpush.bf16.msrb.mxu1 %v2850_v8  ;;  %v3747_v8 = vld [vmem:[#allocation2 + $0x24] sm:$0xf]  ;;  %v2750_v11 = vor.u32 %v3797_v3, %v2747_v4  ;;  %v2843_v50 = vld [vmem:[#allocation2 + $0x278] sm:$0xf0]  ;;  %v3853_v54 = vld [vmem:[#allocation2 + $0x374] sm:$0xf] }
  0x4f   :  { %962 = vmatpush.bf16.msrb.mxu2 %v2914_v9  ;;  %v2547_v9 = vld [vmem:[#allocation2 + $0x28] sm:$0xf0]  ;;  %v2907_v53 = vld [vmem:[#allocation2 + $0x2f8] sm:$0xf0]  ;;  %v2846_v61 = vor.u32 %v3821_v49, %v2843_v50  ;;  %v3819_v0 = vld [vmem:[#allocation2 + $0x264] sm:$0xf] }
  0x50   :  { %975 = vmatpush.bf16.msrb.mxu3 %v2978_v12  ;;  %937 = vmatmul.bf16.vlgmr.msrb.gmra.mxu0 %v4225_v30  ;;  %v2611_v12 = vld [vmem:[#allocation2 + $0xa8] sm:$0xf0]  ;;  %v2550_v21 = vor.u32 %v3747_v8, %v2547_v9  ;;  %v2971_v55 = vld [vmem:[#allocation2 + $0x378] sm:$0xf0]  ;;  %v3835_v2 = vld [vmem:[#allocation2 + $0x2e4] sm:$0xf] }
  0x51   :  { %981 = vmatpush.bf16.msra.mxu0 %v2590_v15  ;;  %950 = vmatmul.bf16.vlgmr.msrb.gmra.mxu1 %v4229_v33  ;;  %v3779_v15 = vld [vmem:[#allocation2 + $0x124] sm:$0xf]  ;;  %v2614_v22 = vor.u32 %v3763_v10, %v2611_v12  ;;  %v2835_v1 = vld [vmem:[#allocation2 + $0x268] sm:$0xf0]  ;;  %v3817_v12 = vld [vmem:[#allocation2 + $0x254] sm:$0xf] }
  0x52   :  { %994 = vmatpush.bf16.msra.mxu1 %v2654_v18  ;;  %963 = vmatmul.bf16.vlgmr.msrb.gmra.mxu2 %v4223_v27  ;;  %v2675_v18 = vld [vmem:[#allocation2 + $0x128] sm:$0xf0]  ;;  %v2838_v9 = vor.u32 %v3819_v0, %v2835_v1  ;;  %v3019_v24 = vld [vmem:[#allocation2 + $0x3d8] sm:$0xf0]  ;;  %v3815_v29 = vld [vmem:[#allocation2 + $0x244] sm:$0xf] }
  0x53   :  { %1007 = vmatpush.bf16.msra.mxu2 %v2718_v19  ;;  %976 = vmatmul.bf16.vlgmr.msrb.gmra.mxu3 %v4227_v31  ;;  %v3795_v19 = vld [vmem:[#allocation2 + $0x1a4] sm:$0xf]  ;;  %v2899_v4 = vld [vmem:[#allocation2 + $0x2e8] sm:$0xf0]  ;;  %v3829_v42 = vld [vmem:[#allocation2 + $0x2b4] sm:$0xf] }
  0x54   :  { %1020 = vmatpush.bf16.msra.mxu3 %v2782_v23  ;;  %v2678_v23 = vor.u32 %v3779_v15, %v2675_v18  ;;  %v2742_v28 = vor.u32 %v3795_v19, %v2739_v20  ;;  %v3027_v8 = vld [vmem:[#allocation2 + $0x3e8] sm:$0xf0]  ;;  %v2902_v10 = vor.u32 %v3835_v2, %v2899_v4  ;;  %v2827_v15 = vld [vmem:[#allocation2 + $0x258] sm:$0xf0]  ;;  %v3833_v18 = vld [vmem:[#allocation2 + $0x2d4] sm:$0xf] }
  0x55   :  { %982 = vmatpush.bf16.msra.mxu0 %v2582_v32  ;;  %v3777_v32 = vld [vmem:[#allocation2 + $0x114] sm:$0xf]  ;;  %v2891_v20 = vld [vmem:[#allocation2 + $0x2d8] sm:$0xf0]  ;;  %v2830_v25 = vor.u32 %v3817_v12, %v2827_v15  ;;  %v2787_v15 = vld [vmem:[#allocation2 + $0x208] sm:$0xf0] }
  0x56   :  { %995 = vmatpush.bf16.msra.mxu1 %v2646_v34  ;;  %v2667_v34 = vld [vmem:[#allocation2 + $0x118] sm:$0xf0]  ;;  %v2894_v26 = vor.u32 %v3833_v18, %v2891_v20  ;;  %v3809_v0 = vld [vmem:[#allocation2 + $0x214] sm:$0xf]  ;;  %v3823_v18 = vld [vmem:[#allocation2 + $0x284] sm:$0xf] }
  0x57   :  { %1008 = vmatpush.bf16.msra.mxu2 %v2710_v35  ;;  %v3793_v35 = vld [vmem:[#allocation2 + $0x194] sm:$0xf]  ;;  %v2670_v41 = vor.u32 %v3777_v32, %v2667_v34  ;;  %v2819_v32 = vld [vmem:[#allocation2 + $0x248] sm:$0xf0]  ;;  %v2795_v1 = vld [vmem:[#allocation2 + $0x218] sm:$0xf0] }
  0x58   :  { %1021 = vmatpush.bf16.msra.mxu3 %v2774_v39  ;;  %v2531_v39 = vld [vmem:[#allocation2 + $0x8] sm:$0xf0]  ;;  %v3825_v2 = vld [vmem:[#allocation2 + $0x294] sm:$0xf]  ;;  %v2859_v4 = vld [vmem:[#allocation2 + $0x298] sm:$0xf0] }
  0x59   :  { %983 = vmatpush.bf16.msra.mxu0 %v2574_v45  ;;  %v2734_v45 = vor.u32 %v3793_v35, %v2731_v36  ;;  %v2534_v52 = vor.u32 %v3743_v38, %v2531_v39  ;;  %v2883_v35 = vld [vmem:[#allocation2 + $0x2c8] sm:$0xf0]  ;;  %v3847_v36 = vld [vmem:[#allocation2 + $0x344] sm:$0xf] }
  0x5a   :  { %996 = vmatpush.bf16.msra.mxu1 %v2638_v46  ;;  %v2659_v46 = vld [vmem:[#allocation2 + $0x108] sm:$0xf0]  ;;  %v3863_v38 = vld [vmem:[#allocation2 + $0x3c4] sm:$0xf] }
  0x5b   :  { %1009 = vmatpush.bf16.msra.mxu2 %v2702_v47  ;;  %v3791_v47 = vld [vmem:[#allocation2 + $0x184] sm:$0xf] }
  0x5c   :  { %1022 = vmatpush.bf16.msra.mxu3 %v2766_v51  ;;  %v3837_v51 = vld [vmem:[#allocation2 + $0x2f4] sm:$0xf]  ;;  %v2726_v60 = vor.u32 %v3791_v47, %v2723_v48  ;;  %v3003_v48 = vld [vmem:[#allocation2 + $0x3b8] sm:$0xf0] }
  0x5d   :  { %984 = vmatpush.bf16.msra.mxu0 %v2566_v57  ;;  %v2662_v57 = vor.u32 %v3775_v44, %v2659_v46  ;;  %v2910_v62 = vor.u32 %v3837_v51, %v2907_v53  ;;  %v2875_v44 = vld [vmem:[#allocation2 + $0x2b8] sm:$0xf0]  ;;  %v3861_v47 = vld [vmem:[#allocation2 + $0x3b4] sm:$0xf]  ;;  %v2803_v53 = vld [vmem:[#allocation2 + $0x228] sm:$0xf0] }
  0x5e   :  { %997 = vmatpush.bf16.msra.mxu1 %v2630_v58  ;;  %v3869_v58 = vld [vmem:[#allocation2 + $0x3f4] sm:$0xf]  ;;  %v2939_v46 = vld [vmem:[#allocation2 + $0x338] sm:$0xf0]  ;;  %v2878_v50 = vor.u32 %v3829_v42, %v2875_v44  ;;  %v3073_v42 = vld [vmem:[%s4506_s4 + $0x40] sm:$0xf] }
  0x5f   :  { %1010 = vmatpush.bf16.msra.mxu2 %v2694_v59  ;;  %v3035_v59 = vld [vmem:[#allocation2 + $0x3f8] sm:$0xf0] }
  0x60   :  { %1023 = vmatpush.bf16.msra.mxu3 %v2758_v63  ;;  %v2974_v63 = vor.u32 %v3853_v54, %v2971_v55  ;;  %v3038_v3 = vor.u32 %v3869_v58, %v3035_v59  ;;  %v3827_v54 = vld [vmem:[#allocation2 + $0x2a4] sm:$0xf]  ;;  %v3006_v55 = vor.u32 %v3861_v47, %v3003_v48  ;;  %v2931_v58 = vld [vmem:[#allocation2 + $0x328] sm:$0xf0] }
  0x61   :  { %985 = vmatpush.bf16.msra.mxu0 %v2558_v5  ;;  %v3851_v5 = vld [vmem:[#allocation2 + $0x364] sm:$0xf] }
  0x62   :  { %998 = vmatpush.bf16.msra.mxu1 %v2622_v6  ;;  %v2963_v6 = vld [vmem:[#allocation2 + $0x368] sm:$0xf0]  ;;  %v3859_v59 = vld [vmem:[#allocation2 + $0x3a4] sm:$0xf] }
  0x63   :  { %1011 = vmatpush.bf16.msra.mxu2 %v2686_v7  ;;  %v3867_v7 = vld [vmem:[#allocation2 + $0x3e4] sm:$0xf] }
  0x64   :  { %1024 = vmatpush.bf16.msra.mxu3 %v2750_v11  ;;  %v2966_v11 = vor.u32 %v3851_v5, %v2963_v6  ;;  %v3030_v19 = vor.u32 %v3867_v7, %v3027_v8  ;;  %v3841_v5 = vld [vmem:[#allocation2 + $0x314] sm:$0xf]  ;;  %v2923_v6 = vld [vmem:[#allocation2 + $0x318] sm:$0xf0] }
  0x65   :  { %986 = vmatpush.bf16.msra.mxu0 %v2550_v21  ;;  %v3849_v21 = vld [vmem:[#allocation2 + $0x354] sm:$0xf]  ;;  %v2987_v8 = vld [vmem:[#allocation2 + $0x398] sm:$0xf0]  ;;  %v2926_v12 = vor.u32 %v3841_v5, %v2923_v6  ;;  %v3041_v6 = vld [vmem:[%s4506_s4] sm:$0xf] }
  0x66   :  { %999 = vmatpush.bf16.msra.mxu1 %v2614_v22  ;;  %v2955_v22 = vld [vmem:[#allocation2 + $0x358] sm:$0xf0]  ;;  %v3857_v7 = vld [vmem:[#allocation2 + $0x394] sm:$0xf] }
  0x67   :  { %1012 = vmatpush.bf16.msra.mxu2 %v2678_v23  ;;  %v3865_v23 = vld [vmem:[#allocation2 + $0x3d4] sm:$0xf]  ;;  %v2990_v20 = vor.u32 %v3857_v7, %v2987_v8  ;;  %v3872_v7 = vld [vmem:[%s4506_s4 + $0x4] sm:$0xf0]  ;;  %v3871_v8 = vld [vmem:[%s4506_s4 + $0x4] sm:$0xf] }
  0x68   :  { %1025 = vmatpush.bf16.msra.mxu3 %v2742_v28  ;;  %v2958_v28 = vor.u32 %v3849_v21, %v2955_v22  ;;  %v3022_v34 = vor.u32 %v3865_v23, %v3019_v24  ;;  %v3839_v21 = vld [vmem:[#allocation2 + $0x304] sm:$0xf]  ;;  %v2915_v22 = vld [vmem:[#allocation2 + $0x308] sm:$0xf0] }
  0x69   :  { %987 = vmatpush.bf16.msra.mxu0 %v2542_v37  ;;  %v2947_v37 = vld [vmem:[#allocation2 + $0x348] sm:$0xf0]  ;;  %v3855_v23 = vld [vmem:[#allocation2 + $0x384] sm:$0xf] }
  0x6a   :  { %1000 = vmatpush.bf16.msra.mxu1 %v2606_v40  ;;  %v3813_v40 = vld [vmem:[#allocation2 + $0x234] sm:$0xf]  ;;  %v2979_v24 = vld [vmem:[#allocation2 + $0x388] sm:$0xf0] }
  0x6b   :  { %1013 = vmatpush.bf16.msra.mxu2 %v2670_v41  ;;  %v2811_v41 = vld [vmem:[#allocation2 + $0x238] sm:$0xf0] }
  0x6c   :  { %1026 = vmatpush.bf16.msra.mxu3 %v2734_v45  ;;  %v3845_v45 = vld [vmem:[#allocation2 + $0x334] sm:$0xf]  ;;  %v2814_v49 = vor.u32 %v3813_v40, %v2811_v41 }
  0x6d   :  { %988 = vmatpush.bf16.msra.mxu0 %v2534_v52  ;;  %v2942_v51 = vor.u32 %v3845_v45, %v2939_v46  ;;  %v3811_v52 = vld [vmem:[#allocation2 + $0x224] sm:$0xf]  ;;  %v3083_v41 = vld [vmem:[%s4506_s4 + $0x58] sm:$0xf0]  ;;  %v3879_v45 = vld [vmem:[%s4506_s4 + $0x44] sm:$0xf] }
  0x6e   :  { %1001 = vmatpush.bf16.msra.mxu1 %v2598_v56  ;;  %v2867_v56 = vld [vmem:[#allocation2 + $0x2a8] sm:$0xf0]  ;;  %v3075_v46 = vld [vmem:[%s4506_s4 + $0x48] sm:$0xf0] }
  0x6f   :  { %1014 = vmatpush.bf16.msra.mxu2 %v2662_v57  ;;  %v3843_v57 = vld [vmem:[#allocation2 + $0x324] sm:$0xf]  ;;  %v3078_v48 = vor.u32 %v3879_v45, %v3075_v46 }
  0x70   :  { %1027 = vmatpush.bf16.msra.mxu3 %v2726_v60  ;;  %989 = vmatmul.bf16.vlgmr.msra.gmra.mxu0 %v4213_v14  ;;  %v3011_v14 = vld [vmem:[#allocation2 + $0x3c8] sm:$0xf0] }
  0x71   :  { %1033 = vmatpush.bf16.msrb.mxu0 %v2846_v61  ;;  %1002 = vmatmul.bf16.vlgmr.msra.gmra.mxu1 %v4218_v17  ;;  %v2950_v17 = vor.u32 %v3847_v36, %v2947_v37  ;;  %v3014_v43 = vor.u32 %v3863_v38, %v3011_v14  ;;  %v2995_v60 = vld [vmem:[#allocation2 + $0x3a8] sm:$0xf0]  ;;  %v2806_v61 = vor.u32 %v3811_v52, %v2803_v53  ;;  %v3089_v38 = vld [vmem:[%s4506_s4 + $0x60] sm:$0xf]  ;;  %v3884_v14 = vld [vmem:[%s4506_s4 + $0x64] sm:$0xf0] }
  0x72   :  { %1046 = vmatpush.bf16.msrb.mxu1 %v2910_v62  ;;  %1015 = vmatmul.bf16.vlgmr.msra.gmra.mxu2 %v4211_v13  ;;  %v3831_v13 = vld [vmem:[#allocation2 + $0x2c4] sm:$0xf]  ;;  %v2870_v62 = vor.u32 %v3827_v54, %v2867_v56  ;;  %v3067_v53 = vld [vmem:[%s4506_s4 + $0x38] sm:$0xf0]  ;;  %v3876_v56 = vld [vmem:[%s4506_s4 + $0x24] sm:$0xf0] }
  0x73   :  { %1059 = vmatpush.bf16.msrb.mxu2 %v2974_v63  ;;  %1028 = vmatmul.bf16.vlgmr.msra.gmra.mxu3 %v4216_v16  ;;  %v2822_v16 = vor.u32 %v3815_v29, %v2819_v32  ;;  %v2886_v39 = vor.u32 %v3831_v13, %v2883_v35  ;;  %v2934_v63 = vor.u32 %v3843_v57, %v2931_v58  ;;  %v3885_v29 = vld [vmem:[%s4506_s4 + $0x74] sm:$0xf]  ;;  %v3099_v32 = vld [vmem:[%s4506_s4 + $0x78] sm:$0xf0]  ;;  %v3875_v57 = vld [vmem:[%s4506_s4 + $0x24] sm:$0xf] }
  0x74   :  { %1072 = vmatpush.bf16.msrb.mxu3 %v3038_v3  ;;  %v2998_v3 = vor.u32 %v3859_v59, %v2995_v60  ;;  %v2982_v35 = vor.u32 %v3855_v23, %v2979_v24  ;;  %v3102_v37 = vor.u32 %v3885_v29, %v3099_v32  ;;  %v3059_v59 = vld [vmem:[%s4506_s4 + $0x28] sm:$0xf0] }
  0x75   :  { %1034 = vmatpush.bf16.msrb.mxu0 %v2838_v9  ;;  %v2798_v9 = vor.u32 %v3809_v0, %v2795_v1  ;;  %v3062_v60 = vor.u32 %v3875_v57, %v3059_v59  ;;  %v3051_v1 = vld [vmem:[%s4506_s4 + $0x18] sm:$0xf0]  ;;  %v3895_v57 = vld [vmem:[%s4506_s4 + $0xc4] sm:$0xf] }
  0x76   :  { %1047 = vmatpush.bf16.msrb.mxu1 %v2902_v10  ;;  %v3807_v10 = vld [vmem:[#allocation2 + $0x204] sm:$0xf] }
  0x77   :  { %1060 = vmatpush.bf16.msrb.mxu2 %v2966_v11  ;;  %v2862_v11 = vor.u32 %v3825_v2, %v2859_v4  ;;  %v4330_v4 = vld [vmem:[%s4505_s3] sm:$0x3] }
  0x78   :  { %1073 = vmatpush.bf16.msrb.mxu3 %v3030_v19  ;;  %v2851_v19 = vld [vmem:[#allocation2 + $0x288] sm:$0xf0] }
  0x79   :  { %1035 = vmatpush.bf16.msrb.mxu0 %v2830_v25  ;;  %v3097_v25 = vld [vmem:[%s4506_s4 + $0x70] sm:$0xf]  ;;  %v2854_v13 = vor.u32 %v3823_v18, %v2851_v19 }
  0x7a   :  { %1048 = vmatpush.bf16.msrb.mxu1 %v2894_v26  ;;  %v3886_v26 = vld [vmem:[%s4506_s4 + $0x74] sm:$0xf0] }
  0x7b   :  { %1061 = vmatpush.bf16.msrb.mxu2 %v2958_v28  ;;  %v2790_v28 = vor.u32 %v3807_v10, %v2787_v15  ;;  %v3098_v36 = vor.u32 %v3886_v26, %v3097_v25  ;;  %v3043_v10 = vld [vmem:[%s4506_s4 + $0x8] sm:$0xf0] }
  0x7c   :  { %1074 = vmatpush.bf16.msrb.mxu3 %v3022_v34  ;;  %v2918_v34 = vor.u32 %v3839_v21, %v2915_v22  ;;  %v3046_v15 = vor.u32 %v3871_v8, %v3043_v10 }
  0x7d   :  { %1036 = vmatpush.bf16.msrb.mxu0 %v2822_v16  ;;  %v3883_v16 = vld [vmem:[%s4506_s4 + $0x64] sm:$0xf] }
  0x7e   :  { %1049 = vmatpush.bf16.msrb.mxu1 %v2886_v39  ;;  %v3882_v39 = vld [vmem:[%s4506_s4 + $0x54] sm:$0xf0] }
  0x7f   :  { %1062 = vmatpush.bf16.msrb.mxu2 %v2950_v17  ;;  %v3881_v17 = vld [vmem:[%s4506_s4 + $0x54] sm:$0xf] }
  0x80   :  { %1075 = vmatpush.bf16.msrb.mxu3 %v3014_v43  ;;  %v3880_v43 = vld [vmem:[%s4506_s4 + $0x44] sm:$0xf0]  ;;  %v3086_v44 = vor.u32 %v3881_v17, %v3083_v41  ;;  %v3155_v41 = vld [vmem:[%s4506_s4 + $0xe8] sm:$0xf0] }
  0x81   :  { %1037 = vmatpush.bf16.msrb.mxu0 %v2814_v49  ;;  %v3074_v47 = vor.u32 %v3880_v43, %v3073_v42  ;;  %v3065_v49 = vld [vmem:[%s4506_s4 + $0x30] sm:$0xf] }
  0x82   :  { %1050 = vmatpush.bf16.msrb.mxu1 %v2878_v50  ;;  %v3878_v50 = vld [vmem:[%s4506_s4 + $0x34] sm:$0xf0] }
  0x83   :  { %1063 = vmatpush.bf16.msrb.mxu2 %v2942_v51  ;;  %v3877_v51 = vld [vmem:[%s4506_s4 + $0x34] sm:$0xf]  ;;  %v3066_v52 = vor.u32 %v3878_v50, %v3065_v49 }
  0x84   :  { %1076 = vmatpush.bf16.msrb.mxu3 %v3006_v55  ;;  %v3070_v54 = vor.u32 %v3877_v51, %v3067_v53  ;;  %v3057_v55 = vld [vmem:[%s4506_s4 + $0x20] sm:$0xf]  ;;  %v3897_v49 = vld [vmem:[%s4506_s4 + $0xd4] sm:$0xf] }
  0x85   :  { %1038 = vmatpush.bf16.msrb.mxu0 %v2806_v61  ;;  %v3058_v58 = vor.u32 %v3876_v56, %v3057_v55  ;;  %v3049_v61 = vld [vmem:[%s4506_s4 + $0x10] sm:$0xf]  ;;  %v3896_v55 = vld [vmem:[%s4506_s4 + $0xc4] sm:$0xf0] }
  0x86   :  { %1051 = vmatpush.bf16.msrb.mxu1 %v2870_v62  ;;  %v3874_v62 = vld [vmem:[%s4506_s4 + $0x14] sm:$0xf0] }
  0x87   :  { %1064 = vmatpush.bf16.msrb.mxu2 %v2934_v63  ;;  %v3873_v63 = vld [vmem:[%s4506_s4 + $0x14] sm:$0xf]  ;;  %v3050_v0 = vor.u32 %v3874_v62, %v3049_v61  ;;  %v3129_v61 = vld [vmem:[%s4506_s4 + $0xb0] sm:$0xf]  ;;  %v3894_v62 = vld [vmem:[%s4506_s4 + $0xb4] sm:$0xf0] }
  0x88   :  { %1077 = vmatpush.bf16.msrb.mxu3 %v2998_v3  ;;  %v3054_v3 = vor.u32 %v3873_v63, %v3051_v1  ;;  %v3893_v63 = vld [vmem:[%s4506_s4 + $0xb4] sm:$0xf]  ;;  %v3131_v1 = vld [vmem:[%s4506_s4 + $0xb8] sm:$0xf0] }
  0x89   :  { %1039 = vmatpush.bf16.msrb.mxu0 %v2798_v9  ;;  %v3042_v9 = vor.u32 %v3872_v7, %v3041_v6  ;;  %v3891_v6 = vld [vmem:[%s4506_s4 + $0xa4] sm:$0xf] }
  0x8a   :  { %1052 = vmatpush.bf16.msrb.mxu1 %v2862_v11  ;;  %v215_v11 = vperm.slane %v4330_v4, 0 }
  0x8b   :  { %1065 = vmatpush.bf16.msrb.mxu2 %v2926_v12 }
  0x8c   :  { %1078 = vmatpush.bf16.msrb.mxu3 %v2990_v20 }
  0x8d   :  { %1040 = vmatpush.bf16.msrb.mxu0 %v2790_v28 }
  0x8e   :  { %1053 = vmatpush.bf16.msrb.mxu1 %v2854_v13 }
  0x8f   :  { %1066 = vmatpush.bf16.msrb.mxu2 %v2918_v34 }
  0x90   :  { %1079 = vmatpush.bf16.msrb.mxu3 %v2982_v35  ;;  %1041 = vmatmul.bf16.vlgmr.msrb.gmra.mxu0 %v4225_v30  ;;  %v3090_v30 = vor.u32 %v3884_v14, %v3089_v38  ;;  %v3902_v38 = vld [vmem:[%s4506_s4 + $0xf4] sm:$0xf0]  ;;  %v3901_v14 = vld [vmem:[%s4506_s4 + $0xf4] sm:$0xf] }
  0x91   :  { %1287 = vmatpush.bf16.msra.mxu0 %v3098_v36  ;;  %1054 = vmatmul.bf16.vlgmr.msrb.gmra.mxu1 %v4229_v33  ;;  %v3091_v33 = vld [vmem:[%s4506_s4 + $0x68] sm:$0xf0] }
  0x92   :  { %1067 = vmatmul.bf16.vlgmr.msrb.gmra.mxu2 %v4223_v27  ;;  %v3094_v27 = vor.u32 %v3883_v16, %v3091_v33  ;;  %v3153_v33 = vld [vmem:[%s4506_s4 + $0xe0] sm:$0xf] }
  0x93   :  { %1313 = vmatpush.bf16.msra.mxu2 %v3102_v37  ;;  %1080 = vmatmul.bf16.vlgmr.msrb.gmra.mxu3 %v4227_v31  ;;  %v3081_v31 = vld [vmem:[%s4506_s4 + $0x50] sm:$0xf] }
  0x94   :  { %v3082_v40 = vor.u32 %v3882_v39, %v3081_v31  ;;  %v3161_v37 = vld [vmem:[%s4506_s4 + $0xf0] sm:$0xf] }
  0x95   :  { %1288 = vmatpush.bf16.msra.mxu0 %v3090_v30  ;;  %v3162_v16 = vor.u32 %v3902_v38, %v3161_v37  ;;  %v3163_v30 = vld [vmem:[%s4506_s4 + $0xf8] sm:$0xf0] }
  0x96   :  { %v3166_v17 = vor.u32 %v3901_v14, %v3163_v30 }
  0x97   :  { %1314 = vmatpush.bf16.msra.mxu2 %v3094_v27  ;;  %v3900_v27 = vld [vmem:[%s4506_s4 + $0xe4] sm:$0xf0]  ;;  %1300 = vmatpush.bf16.msra.mxu1 %v3162_v16 }
  0x98   :  { %v3154_v43 = vor.u32 %v3900_v27, %v3153_v33  ;;  %1326 = vmatpush.bf16.msra.mxu3 %v3166_v17 }
  0x99   :  { %1289 = vmatpush.bf16.msra.mxu0 %v3082_v40  ;;  %v3899_v40 = vld [vmem:[%s4506_s4 + $0xe4] sm:$0xf] }
  0x9a   :  { %v3158_v45 = vor.u32 %v3899_v40, %v3155_v41 }
  0x9b   :  { %1315 = vmatpush.bf16.msra.mxu2 %v3086_v44  ;;  %1301 = vmatpush.bf16.msra.mxu1 %v3154_v43 }
  0x9c   :  { %1327 = vmatpush.bf16.msra.mxu3 %v3158_v45 }
  0x9d   :  { %1290 = vmatpush.bf16.msra.mxu0 %v3074_v47  ;;  %v3145_v47 = vld [vmem:[%s4506_s4 + $0xd0] sm:$0xf] }
  0x9f   :  { %1316 = vmatpush.bf16.msra.mxu2 %v3078_v48  ;;  %v3898_v48 = vld [vmem:[%s4506_s4 + $0xd4] sm:$0xf0] }
  0xa0   :  { %v3146_v51 = vor.u32 %v3898_v48, %v3145_v47  ;;  %v3225_v48 = vld [vmem:[#allocation4 + $0x70] sm:$0xf] }
  0xa1   :  { %1291 = vmatpush.bf16.msra.mxu0 %v3066_v52  ;;  %v3147_v52 = vld [vmem:[%s4506_s4 + $0xd8] sm:$0xf0] }
  0xa2   :  { %v3150_v56 = vor.u32 %v3897_v49, %v3147_v52  ;;  %1302 = vmatpush.bf16.msra.mxu1 %v3146_v51  ;;  %v3918_v49 = vld [vmem:[#allocation4 + $0x74] sm:$0xf0]  ;;  %v3227_v52 = vld [vmem:[#allocation4 + $0x78] sm:$0xf0] }
  0xa3   :  { %1317 = vmatpush.bf16.msra.mxu2 %v3070_v54  ;;  %v3137_v54 = vld [vmem:[%s4506_s4 + $0xc0] sm:$0xf]  ;;  %v3226_v51 = vor.u32 %v3918_v49, %v3225_v48  ;;  %v4039_v48 = vld [vmem:[#allocation6 + $0x3c4] sm:$0xf] }
  0xa4   :  { %v3138_v59 = vor.u32 %v3896_v55, %v3137_v54  ;;  %1328 = vmatpush.bf16.msra.mxu3 %v3150_v56  ;;  %v3916_v54 = vld [vmem:[#allocation4 + $0x64] sm:$0xf0]  ;;  %v3915_v56 = vld [vmem:[#allocation4 + $0x64] sm:$0xf] }
  0xa5   :  { %1292 = vmatpush.bf16.msra.mxu0 %v3058_v58  ;;  %v3139_v58 = vld [vmem:[%s4506_s4 + $0xc8] sm:$0xf0] }
  0xa6   :  { %1303 = vmatpush.bf16.msra.mxu1 %v3138_v59  ;;  %v3715_v49 = vld [vmem:[#allocation6 + $0x3e0] sm:$0xf0] }
  0xa7   :  { %1318 = vmatpush.bf16.msra.mxu2 %v3062_v60  ;;  %v3142_v60 = vor.u32 %v3895_v57, %v3139_v58  ;;  %v3219_v57 = vld [vmem:[#allocation4 + $0x68] sm:$0xf0] }
  0xa8   :  { %v3222_v59 = vor.u32 %v3915_v56, %v3219_v57  ;;  %v3967_v57 = vld [vmem:[#allocation6 + $0x184] sm:$0xf] }
  0xa9   :  { %1293 = vmatpush.bf16.msra.mxu0 %v3050_v0  ;;  %1329 = vmatpush.bf16.msra.mxu3 %v3142_v60  ;;  %v3130_v0 = vor.u32 %v3894_v62, %v3129_v61 }
  0xab   :  { %1319 = vmatpush.bf16.msra.mxu2 %v3054_v3  ;;  %1304 = vmatpush.bf16.msra.mxu1 %v3130_v0  ;;  %v3121_v3 = vld [vmem:[%s4506_s4 + $0xa0] sm:$0xf]  ;;  %v3209_v0 = vld [vmem:[#allocation4 + $0x50] sm:$0xf] }
  0xad   :  { %v886_v2 = vpop.f32.mrf.mxu0  ;;  %1294 = vmatpush.bf16.msra.mxu0 %v3042_v9  ;;  %v3123_v9 = vld [vmem:[%s4506_s4 + $0xa8] sm:$0xf0] }
  0xae   :  { %v899_v5 = vpop.f32.mrf.mxu1  ;;  %v887_v19 = vadd.f32 %v886_v2, %v215_v11  ;;  %v3134_v2 = vor.u32 %v3893_v63, %v3131_v1  ;;  %v3126_v11 = vor.u32 %v3891_v6, %v3123_v9  ;;  %v3914_v1 = vld [vmem:[#allocation4 + $0x54] sm:$0xf0]  ;;  %v3911_v9 = vld [vmem:[#allocation4 + $0x44] sm:$0xf] }
  0xaf   :  { %1320 = vmatpush.bf16.msra.mxu2 %v3046_v15  ;;  %v3890_v15 = vld [vmem:[%s4506_s4 + $0x94] sm:$0xf0] }
  0xb0   :  { %v900_v22 = vadd.f32 %v899_v5, %v887_v19  ;;  %1330 = vmatpush.bf16.msra.mxu3 %v3134_v2  ;;  %v3892_v5 = vld [vmem:[%s4506_s4 + $0xa4] sm:$0xf0]  ;;  %v3913_v2 = vld [vmem:[#allocation4 + $0x54] sm:$0xf] }
  0xb1   :  { %v3122_v8 = vor.u32 %v3892_v5, %v3121_v3  ;;  %1455 = vmatpush.bf16.msrb.mxu0 %v3226_v51  ;;  %v3210_v3 = vor.u32 %v3914_v1, %v3209_v0  ;;  %v3211_v5 = vld [vmem:[#allocation4 + $0x58] sm:$0xf0]  ;;  %v3718_v51 = vor.u32 %v4039_v48, %v3715_v49  ;;  %v3393_v0 = vld [vmem:[#allocation6 + $0x140] sm:$0xf] }
  0xb2   :  { %v3214_v6 = vor.u32 %v3913_v2, %v3211_v5  ;;  %v3963_v1 = vld [vmem:[#allocation6 + $0x15c] sm:$0xf0] }
  0xb3   :  { %1305 = vmatpush.bf16.msra.mxu1 %v3122_v8  ;;  %v3912_v8 = vld [vmem:[#allocation4 + $0x44] sm:$0xf0]  ;;  %v3649_v5 = vld [vmem:[#allocation6 + $0x340] sm:$0xf] }
  0xb4   :  { %1331 = vmatpush.bf16.msra.mxu3 %v3126_v11  ;;  %v3203_v11 = vld [vmem:[#allocation4 + $0x48] sm:$0xf0] }
  0xb5   :  { %v912_v12 = vpop.f32.mrf.mxu2  ;;  %v888_v20 = vpop.f32.mrf.mxu0 }
  0xb6   :  { %v925_v18 = vpop.f32.mrf.mxu3  ;;  %v901_v21 = vpop.f32.mrf.mxu1  ;;  %v913_v25 = vadd.f32 %v912_v12, %v900_v22  ;;  %v3113_v12 = vld [vmem:[%s4506_s4 + $0x90] sm:$0xf]  ;;  %v3115_v20 = vld [vmem:[%s4506_s4 + $0x98] sm:$0xf0] }
  0xb7   :  { %v3114_v19 = vor.u32 %v3890_v15, %v3113_v12  ;;  %v3206_v12 = vor.u32 %v3911_v9, %v3203_v11  ;;  %v3193_v15 = vld [vmem:[#allocation4 + $0x30] sm:$0xf]  ;;  %v3395_v9 = vld [vmem:[#allocation6 + $0x160] sm:$0xf0] }
  0xb8   :  { %v926_v26 = vadd.f32 %v925_v18, %v913_v25  ;;  %v3889_v18 = vld [vmem:[%s4506_s4 + $0x94] sm:$0xf]  ;;  %v3888_v25 = vld [vmem:[%s4506_s4 + $0x84] sm:$0xf0]  ;;  %v3651_v11 = vld [vmem:[#allocation6 + $0x360] sm:$0xf0] }
  0xb9   :  { %v3118_v22 = vor.u32 %v3889_v18, %v3115_v20  ;;  %1306 = vmatpush.bf16.msra.mxu1 %v3114_v19  ;;  %v3910_v18 = vld [vmem:[#allocation4 + $0x34] sm:$0xf0]  ;;  %v3909_v20 = vld [vmem:[#allocation4 + $0x34] sm:$0xf] }
  0xba   :  { %v3194_v19 = vor.u32 %v3910_v18, %v3193_v15  ;;  %v3361_v18 = vld [vmem:[#allocation6 + $0x100] sm:$0xf] }
  0xbb   :  { %1332 = vmatpush.bf16.msra.mxu3 %v3118_v22 }
  0xbd   :  { %v914_v23 = vpop.f32.mrf.mxu2 }
  0xbe   :  { %v927_v24 = vpop.f32.mrf.mxu3 }
  0xbf   :  { %v3105_v24 = vld [vmem:[%s4506_s4 + $0x80] sm:$0xf] }
  0xcd   :  { %v938_v28 = vpop.f32.mrf.mxu0 }
  0xce   :  { %v939_v29 = vadd.f32 %v938_v28, %v926_v26  ;;  %v951_v32 = vpop.f32.mrf.mxu1  ;;  %v3887_v26 = vld [vmem:[%s4506_s4 + $0x84] sm:$0xf] }
  0xd0   :  { %v952_v13 = vadd.f32 %v951_v32, %v939_v29  ;;  %v3106_v29 = vor.u32 %v3888_v25, %v3105_v24  ;;  %v3107_v32 = vld [vmem:[%s4506_s4 + $0x88] sm:$0xf0]  ;;  %v3908_v24 = vld [vmem:[#allocation4 + $0x24] sm:$0xf0] }
  0xd1   :  { %v3907_v25 = vld [vmem:[#allocation4 + $0x24] sm:$0xf] }
  0xd2   :  { %1307 = vmatpush.bf16.msra.mxu1 %v3106_v29  ;;  %v3177_v29 = vld [vmem:[#allocation4 + $0x10] sm:$0xf] }
  0xd5   :  { %v964_v34 = vpop.f32.mrf.mxu2  ;;  %v940_v39 = vpop.f32.mrf.mxu0 }
  0xd6   :  { %v965_v35 = vadd.f32 %v964_v34, %v952_v13  ;;  %v977_v36 = vpop.f32.mrf.mxu3  ;;  %v953_v42 = vpop.f32.mrf.mxu1  ;;  %v3110_v34 = vor.u32 %v3887_v26, %v3107_v32  ;;  %v3906_v32 = vld [vmem:[#allocation4 + $0x14] sm:$0xf0] }
  0xd8   :  { %v978_v31 = vadd.f32 %v977_v36, %v965_v35  ;;  %1333 = vmatpush.bf16.msra.mxu3 %v3110_v34  ;;  %v216_v35 = vperm.slane %v4330_v4, 1  ;;  %v3905_v34 = vld [vmem:[#allocation4 + $0x14] sm:$0xf] }
  0xda   :  { %v1085_v44 = vmax.f32 %v978_v31, 0.0 }
  0xdc   :  { %v1087_v46 = vpack.c.bf16 %v1085_v44, %v1085_v44 }
  0xdd   :  { %v966_v50 = vpop.f32.mrf.mxu2 }
  0xde   :  { %1295 = vmatmul.bf16.vlgmr.msra.gmra.mxu0 %v1087_v46  ;;  %1321 = vmatmul.bf16.vlgmr.msra.gmra.mxu2 %v1087_v46  ;;  %v979_v53 = vpop.f32.mrf.mxu3  ;;  %v3917_v50 = vld [vmem:[#allocation4 + $0x74] sm:$0xf] }
  0xdf   :  { %v3217_v53 = vld [vmem:[#allocation4 + $0x60] sm:$0xf]  ;;  %v3230_v55 = vor.u32 %v3917_v50, %v3227_v52 }
  0xe0   :  { %v3218_v58 = vor.u32 %v3916_v54, %v3217_v53  ;;  %v3425_v50 = vld [vmem:[#allocation6 + $0x180] sm:$0xf] }
  0xe1   :  { %1468 = vmatpush.bf16.msrb.mxu1 %v3230_v55  ;;  %v3971_v52 = vld [vmem:[#allocation6 + $0x19c] sm:$0xf0] }
  0xe2   :  { %1456 = vmatpush.bf16.msrb.mxu0 %v3218_v58  ;;  %v3681_v53 = vld [vmem:[#allocation6 + $0x380] sm:$0xf]  ;;  %v3426_v55 = vor.u32 %v3971_v52, %v3425_v50  ;;  %v3427_v58 = vld [vmem:[#allocation6 + $0x1a0] sm:$0xf0] }
  0xe3   :  { %v4035_v54 = vld [vmem:[#allocation6 + $0x39c] sm:$0xf0]  ;;  %v3935_v50 = vld [vmem:[#allocation6 + $0x84] sm:$0xf] }
  0xe4   :  { %v3682_v56 = vor.u32 %v4035_v54, %v3681_v53  ;;  %v3999_v52 = vld [vmem:[#allocation6 + $0x284] sm:$0xf] }
  0xe5   :  { %1469 = vmatpush.bf16.msrb.mxu1 %v3222_v59  ;;  %v4031_v59 = vld [vmem:[#allocation6 + $0x384] sm:$0xf] }
  0xe6   :  { %1457 = vmatpush.bf16.msrb.mxu0 %v3210_v3  ;;  %v3555_v53 = vld [vmem:[#allocation6 + $0x2a0] sm:$0xf0] }
  0xe9   :  { %1470 = vmatpush.bf16.msrb.mxu1 %v3214_v6  ;;  %v4027_v6 = vld [vmem:[#allocation6 + $0x35c] sm:$0xf0] }
  0xed   :  { %v990_v7 = vpop.f32.mrf.mxu0  ;;  %1471 = vmatpush.bf16.msrb.mxu1 %v3206_v12  ;;  %v3650_v12 = vor.u32 %v4027_v6, %v3649_v5  ;;  %v3523_v5 = vld [vmem:[#allocation6 + $0x260] sm:$0xf0]  ;;  %v1349_v6 = vld [vmem:[%s4503_s1] sm:$0x3] }
  0xee   :  { %v1003_v10 = vpop.f32.mrf.mxu1  ;;  %v991_v38 = vadd.f32 %v990_v7, %v216_v35  ;;  %v3201_v7 = vld [vmem:[#allocation4 + $0x40] sm:$0xf]  ;;  %v3179_v35 = vld [vmem:[#allocation4 + $0x18] sm:$0xf0] }
  0xf0   :  { %v1004_v14 = vadd.f32 %v1003_v10, %v991_v38  ;;  %v3202_v10 = vor.u32 %v3912_v8, %v3201_v7  ;;  %v3169_v38 = vld [vmem:[#allocation4] sm:$0xf]  ;;  %v3959_v7 = vld [vmem:[#allocation6 + $0x144] sm:$0xf]  ;;  %v3394_v8 = vor.u32 %v3963_v1, %v3393_v0 }
  0xf1   :  { %v3398_v15 = vor.u32 %v3959_v7, %v3395_v9  ;;  %v3995_v0 = vld [vmem:[#allocation6 + $0x25c] sm:$0xf0]  ;;  %v3927_v1 = vld [vmem:[#allocation6 + $0x44] sm:$0xf] }
  0xf2   :  { %1458 = vmatpush.bf16.msrb.mxu0 %v3202_v10  ;;  %v4023_v10 = vld [vmem:[#allocation6 + $0x344] sm:$0xf] }
  0xf5   :  { %v1016_v21 = vpop.f32.mrf.mxu2  ;;  %v992_v28 = vpop.f32.mrf.mxu0 }
  0xf6   :  { %v1029_v23 = vpop.f32.mrf.mxu3  ;;  %v1005_v13 = vpop.f32.mrf.mxu1  ;;  %v1017_v16 = vadd.f32 %v1016_v21, %v1004_v14  ;;  %v3195_v21 = vld [vmem:[#allocation4 + $0x38] sm:$0xf0]  ;;  %1459 = vmatpush.bf16.msrb.mxu0 %v3194_v19  ;;  %v3187_v28 = vld [vmem:[#allocation4 + $0x28] sm:$0xf0]  ;;  %v3904_v14 = vld [vmem:[#allocation4 + $0x4] sm:$0xf0] }
  0xf7   :  { %v3198_v22 = vor.u32 %v3909_v20, %v3195_v21  ;;  %v3190_v13 = vor.u32 %v3907_v25, %v3187_v28  ;;  %v3955_v19 = vld [vmem:[#allocation6 + $0x11c] sm:$0xf0]  ;;  %v3654_v21 = vor.u32 %v4023_v10, %v3651_v11  ;;  %v4015_v25 = vld [vmem:[#allocation6 + $0x304] sm:$0xf] }
  0xf8   :  { %v1030_v30 = vadd.f32 %v1029_v23, %v1017_v16  ;;  %v3185_v23 = vld [vmem:[#allocation4 + $0x20] sm:$0xf]  ;;  %v3903_v16 = vld [vmem:[#allocation4 + $0x4] sm:$0xf] }
  0xf9   :  { %1472 = vmatpush.bf16.msrb.mxu1 %v3198_v22  ;;  %v3186_v26 = vor.u32 %v3908_v24, %v3185_v23  ;;  %v3617_v20 = vld [vmem:[#allocation6 + $0x300] sm:$0xf]  ;;  %v3951_v23 = vld [vmem:[#allocation6 + $0x104] sm:$0xf] }
  0xfa   :  { %v4019_v22 = vld [vmem:[#allocation6 + $0x31c] sm:$0xf0]  ;;  %v3363_v24 = vld [vmem:[#allocation6 + $0x120] sm:$0xf0] }
  0xfb   :  { %1460 = vmatpush.bf16.msrb.mxu0 %v3186_v26  ;;  %v3619_v26 = vld [vmem:[#allocation6 + $0x320] sm:$0xf0]  ;;  %v3233_v10 = vld [vmem:[#allocation6] sm:$0xf] }
  0xfc   :  { %v3923_v11 = vld [vmem:[#allocation6 + $0x1c] sm:$0xf0] }
  0xfd   :  { %v1018_v36 = vpop.f32.mrf.mxu2  ;;  %1473 = vmatpush.bf16.msrb.mxu1 %v3190_v13  ;;  %v3618_v13 = vor.u32 %v4019_v22, %v3617_v20  ;;  %v3919_v20 = vld [vmem:[#allocation6 + $0x4] sm:$0xf] }
  0xfe   :  { %v1031_v37 = vpop.f32.mrf.mxu3  ;;  %v3178_v36 = vor.u32 %v3906_v32, %v3177_v29  ;;  %v3362_v29 = vor.u32 %v3955_v19, %v3361_v18  ;;  %v3489_v18 = vld [vmem:[#allocation6 + $0x200] sm:$0xf]  ;;  %v3235_v22 = vld [vmem:[#allocation6 + $0x20] sm:$0xf0] }
  0xff   :  { %v3182_v37 = vor.u32 %v3905_v34, %v3179_v35  ;;  %v3366_v34 = vor.u32 %v3951_v23, %v3363_v24  ;;  %v3329_v35 = vld [vmem:[#allocation6 + $0xc0] sm:$0xf]  ;;  %v3983_v23 = vld [vmem:[#allocation6 + $0x204] sm:$0xf] }
 0x100   :  { %1461 = vmatpush.bf16.msrb.mxu0 %v3178_v36  ;;  %v3947_v36 = vld [vmem:[#allocation6 + $0xdc] sm:$0xf0]  ;;  %v3491_v24 = vld [vmem:[#allocation6 + $0x220] sm:$0xf0] }
 0x101   :  { %1474 = vmatpush.bf16.msrb.mxu1 %v3182_v37  ;;  %v3585_v37 = vld [vmem:[#allocation6 + $0x2c0] sm:$0xf] }
 0x102   :  { %v3987_v19 = vld [vmem:[#allocation6 + $0x21c] sm:$0xf0] }
 0x10d   :  { %v1042_v33 = vpop.f32.mrf.mxu0 }
 0x10e   :  { %v1055_v27 = vpop.f32.mrf.mxu1  ;;  %v1043_v31 = vadd.f32 %v1042_v33, %v1030_v30  ;;  %v3171_v30 = vld [vmem:[#allocation4 + $0x8] sm:$0xf0]  ;;  %v3170_v33 = vor.u32 %v3904_v14, %v3169_v38 }
 0x110   :  { %v1056_v39 = vadd.f32 %v1055_v27, %v1043_v31  ;;  %v3174_v27 = vor.u32 %v3903_v16, %v3171_v30  ;;  %v4449_v31 = vld [vmem:[%s4507_s5] sm:$0x3]  ;;  %1462 = vmatpush.bf16.msrb.mxu0 %v3170_v33  ;;  %v3622_v16 = vor.u32 %v4015_v25, %v3619_v26  ;;  %v4011_v30 = vld [vmem:[#allocation6 + $0x2dc] sm:$0xf0]  ;;  %v3943_v33 = vld [vmem:[#allocation6 + $0xc4] sm:$0xf]  ;;  %v3234_v25 = vor.u32 %v3923_v11, %v3233_v10 }
 0x111   :  { %v3465_v26 = vld [vmem:[#allocation6 + $0x1c8] sm:$0xf] }
 0x112   :  { %1475 = vmatpush.bf16.msrb.mxu1 %v3174_v27  ;;  %v3337_v10 = vld [vmem:[#allocation6 + $0xc8] sm:$0xf] }
 0x113   :  { %v3948_v11 = vld [vmem:[#allocation6 + $0xe4] sm:$0xf0] }
 0x115   :  { %v1068_v17 = vpop.f32.mrf.mxu2  ;;  %v1044_v42 = vpop.f32.mrf.mxu0 }
 0x116   :  { %v1069_v40 = vadd.f32 %v1068_v17, %v1056_v39  ;;  %v1081_v41 = vpop.f32.mrf.mxu3  ;;  %v1057_v43 = vpop.f32.mrf.mxu1  ;;  %v1123_v39 = vperm.slane %v4449_v31, 0  ;;  %v1124_v17 = vperm.slane %v4449_v31, 1  ;;  %v3713_v42 = vld [vmem:[#allocation6 + $0x3c0] sm:$0xf] }
 0x118   :  { %v1082_v44 = vadd.f32 %v1081_v41, %v1069_v40  ;;  %v3457_v40 = vld [vmem:[#allocation6 + $0x1c0] sm:$0xf] }
 0x119   :  { %v3979_v41 = vld [vmem:[#allocation6 + $0x1dc] sm:$0xf0] }
 0x11a   :  { %v1086_v45 = vmax.f32 %v1082_v44, 0.0  ;;  %v3458_v43 = vor.u32 %v3979_v41, %v3457_v40  ;;  %v4043_v44 = vld [vmem:[#allocation6 + $0x3dc] sm:$0xf0]  ;;  %v3587_v40 = vld [vmem:[#allocation6 + $0x2e0] sm:$0xf0] }
 0x11c   :  { %v1088_v46 = vpack.c.bf16 %v1086_v45, %v1086_v45  ;;  %v3975_v45 = vld [vmem:[#allocation6 + $0x1c4] sm:$0xf]  ;;  %2271 = vmatpush.bf16.msrb.mxu2 %v3458_v43 }
 0x11d   :  { %v1070_v47 = vpop.f32.mrf.mxu2 }
 0x11e   :  { %v1083_v4 = vpop.f32.mrf.mxu3  ;;  %1308 = vmatmul.bf16.vlgmr.msra.gmra.mxu1 %v1088_v46  ;;  %1334 = vmatmul.bf16.vlgmr.msra.gmra.mxu3 %v1088_v46  ;;  %v3459_v46 = vld [vmem:[#allocation6 + $0x1e0] sm:$0xf0]  ;;  %v3714_v47 = vor.u32 %v4043_v44, %v3713_v42  ;;  %v3330_v44 = vor.u32 %v3947_v36, %v3329_v35  ;;  %v3467_v35 = vld [vmem:[#allocation6 + $0x1e8] sm:$0xf0]  ;;  %v3490_v36 = vor.u32 %v3987_v19, %v3489_v18  ;;  %v4012_v18 = vld [vmem:[#allocation6 + $0x2e4] sm:$0xf0] }
 0x11f   :  { %v3462_v4 = vor.u32 %v3975_v45, %v3459_v46  ;;  %2310 = vmatpush.bf16.msra.mxu1 %v3718_v51  ;;  %v3297_v45 = vld [vmem:[#allocation6 + $0x80] sm:$0xf]  ;;  %v3299_v51 = vld [vmem:[#allocation6 + $0xa0] sm:$0xf0]  ;;  %v3944_v19 = vld [vmem:[#allocation6 + $0xcc] sm:$0xf] }
 0x120   :  { %2284 = vmatpush.bf16.msrb.mxu3 %v3714_v47  ;;  %2272 = vmatpush.bf16.msrb.mxu2 %v3426_v55  ;;  %v3553_v46 = vld [vmem:[#allocation6 + $0x280] sm:$0xf] }
 0x121   :  { %2297 = vmatpush.bf16.msra.mxu0 %v3462_v4  ;;  %v4003_v47 = vld [vmem:[#allocation6 + $0x29c] sm:$0xf0] }
 0x124   :  { %2285 = vmatpush.bf16.msrb.mxu3 %v3682_v56  ;;  %2273 = vmatpush.bf16.msrb.mxu2 %v3394_v8  ;;  %v3554_v56 = vor.u32 %v4003_v47, %v3553_v46 }
 0x128   :  { %2286 = vmatpush.bf16.msrb.mxu3 %v3650_v12  ;;  %2274 = vmatpush.bf16.msrb.mxu2 %v3362_v29  ;;  %v3721_v29 = vld [vmem:[#allocation6 + $0x3c8] sm:$0xf] }
 0x12c   :  { %2287 = vmatpush.bf16.msrb.mxu3 %v3618_v13  ;;  %2275 = vmatpush.bf16.msrb.mxu2 %v3330_v44  ;;  %v4044_v13 = vld [vmem:[#allocation6 + $0x3e4] sm:$0xf0]  ;;  %v3968_v44 = vld [vmem:[#allocation6 + $0x18c] sm:$0xf] }
 0x15b   :  { %v4442_v60 = vpop.f32.mrf.mxu0 }
 0x15c   :  { %v1297_v38 = vadd.f32 %v4442_v60, %v1123_v39  ;;  %v3586_v60 = vor.u32 %v4011_v30, %v3585_v37  ;;  %v3939_v39 = vld [vmem:[#allocation6 + $0x9c] sm:$0xf0]  ;;  %v3238_v37 = vor.u32 %v3919_v20, %v3235_v22  ;;  %v3494_v30 = vor.u32 %v3983_v23, %v3491_v24  ;;  %v3339_v20 = vld [vmem:[#allocation6 + $0xe8] sm:$0xf0] }
 0x15d   :  { %v3298_v54 = vor.u32 %v3939_v39, %v3297_v45  ;;  %v3435_v45 = vld [vmem:[#allocation6 + $0x1a8] sm:$0xf0]  ;;  %v3338_v23 = vor.u32 %v3948_v11, %v3337_v10  ;;  %v4041_v10 = vld [vmem:[#allocation6 + $0x3d4] sm:$0xf] }
 0x15e   :  { %2288 = vmatpush.bf16.msrb.mxu3 %v3586_v60  ;;  %v4032_v60 = vld [vmem:[#allocation6 + $0x38c] sm:$0xf]  ;;  %v3438_v47 = vor.u32 %v3968_v44, %v3435_v45  ;;  %v3731_v11 = vld [vmem:[#allocation6 + $0x3f0] sm:$0xf0] }
 0x15f   :  { %2276 = vmatpush.bf16.msrb.mxu2 %v3298_v54  ;;  %v4024_v54 = vld [vmem:[#allocation6 + $0x34c] sm:$0xf] }
 0x160   :  { %v3595_v22 = vld [vmem:[#allocation6 + $0x2e8] sm:$0xf0] }
 0x161   :  { %v4444_v61 = vpop.f32.mrf.mxu2  ;;  %v3992_v44 = vld [vmem:[#allocation6 + $0x24c] sm:$0xf] }
 0x162   :  { %v1323_v28 = vadd.f32 %v4444_v61, %v1124_v17  ;;  %v3331_v61 = vld [vmem:[#allocation6 + $0xe0] sm:$0xf0]  ;;  %2289 = vmatpush.bf16.msrb.mxu3 %v3554_v56  ;;  %v3531_v45 = vld [vmem:[#allocation6 + $0x268] sm:$0xf0] }
 0x163   :  { %v1298_v62 = vpop.f32.mrf.mxu0  ;;  %v4007_v17 = vld [vmem:[#allocation6 + $0x2c4] sm:$0xf]  ;;  %v3334_v31 = vor.u32 %v3943_v33, %v3331_v61  ;;  %v3722_v61 = vor.u32 %v4044_v13, %v3721_v29  ;;  %v3561_v29 = vld [vmem:[#allocation6 + $0x288] sm:$0xf] }
 0x164   :  { %v3430_v62 = vor.u32 %v3967_v57, %v3427_v58  ;;  %v3590_v49 = vor.u32 %v4007_v17, %v3587_v40  ;;  %v3302_v57 = vor.u32 %v3935_v50, %v3299_v51  ;;  %v3265_v58 = vld [vmem:[#allocation6 + $0x40] sm:$0xf]  ;;  %v3433_v17 = vld [vmem:[#allocation6 + $0x188] sm:$0xf] }
 0x165   :  { %v3972_v40 = vld [vmem:[#allocation6 + $0x1a4] sm:$0xf0] }
 0x166   :  { %2298 = vmatpush.bf16.msra.mxu0 %v3430_v62  ;;  %v3521_v62 = vld [vmem:[#allocation6 + $0x240] sm:$0xf]  ;;  %v3434_v39 = vor.u32 %v3972_v40, %v3433_v17  ;;  %v4028_v51 = vld [vmem:[#allocation6 + $0x364] sm:$0xf0] }
 0x167   :  { %v3522_v8 = vor.u32 %v3995_v0, %v3521_v62  ;;  %v3956_v62 = vld [vmem:[#allocation6 + $0x124] sm:$0xf0] }
 0x168   :  { %v4004_v13 = vld [vmem:[#allocation6 + $0x2a4] sm:$0xf0] }
 0x169   :  { %v1324_v63 = vpop.f32.mrf.mxu2  ;;  %2290 = vmatpush.bf16.msrb.mxu3 %v3522_v8  ;;  %v3529_v17 = vld [vmem:[#allocation6 + $0x248] sm:$0xf] }
 0x16a   :  { %v3683_v63 = vld [vmem:[#allocation6 + $0x3a0] sm:$0xf0]  ;;  %2299 = vmatpush.bf16.msra.mxu0 %v3398_v15  ;;  %v3996_v40 = vld [vmem:[#allocation6 + $0x264] sm:$0xf0] }
 0x16b   :  { %v3686_v3 = vor.u32 %v4031_v59, %v3683_v63  ;;  %v3931_v59 = vld [vmem:[#allocation6 + $0x5c] sm:$0xf0]  ;;  %v3558_v63 = vor.u32 %v3999_v52, %v3555_v53  ;;  %v3960_v52 = vld [vmem:[#allocation6 + $0x14c] sm:$0xf] }
 0x16c   :  { %v3266_v7 = vor.u32 %v3931_v59, %v3265_v58  ;;  %v3403_v53 = vld [vmem:[#allocation6 + $0x168] sm:$0xf0]  ;;  %v3369_v59 = vld [vmem:[#allocation6 + $0x108] sm:$0xf] }
 0x16d   :  { %2311 = vmatpush.bf16.msra.mxu1 %v3686_v3  ;;  %v3991_v3 = vld [vmem:[#allocation6 + $0x244] sm:$0xf]  ;;  %2291 = vmatpush.bf16.msrb.mxu3 %v3490_v36  ;;  %v3406_v58 = vor.u32 %v3960_v52, %v3403_v53  ;;  %v4000_v36 = vld [vmem:[#allocation6 + $0x28c] sm:$0xf] }
 0x16e   :  { %2300 = vmatpush.bf16.msra.mxu0 %v3366_v34  ;;  %v3526_v15 = vor.u32 %v3991_v3, %v3523_v5  ;;  %2277 = vmatpush.bf16.msrb.mxu2 %v3266_v7  ;;  %v3976_v34 = vld [vmem:[#allocation6 + $0x1cc] sm:$0xf]  ;;  %v3370_v7 = vor.u32 %v3956_v62, %v3369_v59 }
 0x16f   :  { %v3371_v3 = vld [vmem:[#allocation6 + $0x128] sm:$0xf0] }
 0x170   :  { %v4016_v5 = vld [vmem:[#allocation6 + $0x30c] sm:$0xf] }
 0x171   :  { %2312 = vmatpush.bf16.msra.mxu1 %v3654_v21  ;;  %2336 = vmatpush.bf16.msra.mxu3 %v3722_v61  ;;  %v3932_v61 = vld [vmem:[#allocation6 + $0x64] sm:$0xf0]  ;;  %v3984_v53 = vld [vmem:[#allocation6 + $0x20c] sm:$0xf] }
 0x172   :  { %2301 = vmatpush.bf16.msra.mxu0 %v3334_v31  ;;  %2278 = vmatpush.bf16.msrb.mxu2 %v3234_v25  ;;  %v3691_v31 = vld [vmem:[#allocation6 + $0x3a8] sm:$0xf0]  ;;  %v3342_v25 = vor.u32 %v3944_v19, %v3339_v20  ;;  %v3441_v20 = vld [vmem:[#allocation6 + $0x190] sm:$0xf] }
 0x173   :  { %v3694_v50 = vor.u32 %v4032_v60, %v3691_v31  ;;  %v3534_v31 = vor.u32 %v3992_v44, %v3531_v45  ;;  %v3957_v44 = vld [vmem:[#allocation6 + $0x12c] sm:$0xf0] }
 0x175   :  { %2313 = vmatpush.bf16.msra.mxu1 %v3622_v16 }
 0x176   :  { %2302 = vmatpush.bf16.msra.mxu0 %v3302_v57 }
 0x179   :  { %2314 = vmatpush.bf16.msra.mxu1 %v3590_v49  ;;  %v3657_v49 = vld [vmem:[#allocation6 + $0x348] sm:$0xf] }
 0x17a   :  { %v3658_v57 = vor.u32 %v4028_v51, %v3657_v49  ;;  %v3920_v49 = vld [vmem:[#allocation6 + $0xc] sm:$0xf] }
 0x17d   :  { %2315 = vmatpush.bf16.msra.mxu1 %v3558_v63  ;;  %v3625_v63 = vld [vmem:[#allocation6 + $0x308] sm:$0xf] }
 0x181   :  { %2316 = vmatpush.bf16.msra.mxu1 %v3526_v15 }
 0x185   :  { %2317 = vmatpush.bf16.msra.mxu1 %v3494_v30 }
 0x19b   :  { %v1309_v2 = vpop.f32.mrf.mxu1 }
 0x19c   :  { %v4457_v41 = vadd.f32 %v1309_v2, %v1297_v38  ;;  %v3267_v2 = vld [vmem:[#allocation6 + $0x60] sm:$0xf0]  ;;  %v4040_v38 = vld [vmem:[#allocation6 + $0x3cc] sm:$0xf] }
 0x19d   :  { %v3270_v9 = vor.u32 %v3927_v1, %v3267_v2  ;;  %v4020_v1 = vld [vmem:[#allocation6 + $0x324] sm:$0xf0]  ;;  %v3952_v2 = vld [vmem:[#allocation6 + $0x10c] sm:$0xf] }
 0x19e   :  { %v3626_v8 = vor.u32 %v4020_v1, %v3625_v63  ;;  %v3473_v1 = vld [vmem:[#allocation6 + $0x1d0] sm:$0xf] }
 0x19f   :  { %2303 = vmatpush.bf16.msra.mxu0 %v3270_v9  ;;  %v3374_v9 = vor.u32 %v3952_v2, %v3371_v3  ;;  %v3981_v2 = vld [vmem:[#allocation6 + $0x1ec] sm:$0xf0] }
 0x1a0   :  { %v3729_v3 = vld [vmem:[#allocation6 + $0x3d0] sm:$0xf] }
 0x1a1   :  { %v1335_v32 = vpop.f32.mrf.mxu3 }
 0x1a2   :  { %v1336_v14 = vadd.f32 %v1335_v32, %v1323_v28  ;;  %v3980_v28 = vld [vmem:[#allocation6 + $0x1e4] sm:$0xf0] }
 0x1a3   :  { %v1311_v27 = vpop.f32.mrf.mxu1  ;;  %v3466_v33 = vor.u32 %v3980_v28, %v3465_v26  ;;  %2304 = vmatpush.bf16.msra.mxu0 %v3238_v37  ;;  %v3305_v26 = vld [vmem:[#allocation6 + $0x88] sm:$0xf]  ;;  %v3563_v37 = vld [vmem:[#allocation6 + $0x2a8] sm:$0xf0] }
 0x1a4   :  { %v1341_v42 = vrot.slane %v1336_v14, 6  ;;  %v1346_v43 = vmul.f32 0.5, %v1336_v14  ;;  %v3723_v14 = vld [vmem:[#allocation6 + $0x3e8] sm:$0xf0]  ;;  %v3470_v27 = vor.u32 %v3976_v34, %v3467_v35  ;;  %v3940_v28 = vld [vmem:[#allocation6 + $0xa4] sm:$0xf0]  ;;  %v3566_v30 = vor.u32 %v4000_v36, %v3563_v37 }
 0x1a5   :  { %2323 = vmatpush.bf16.msra.mxu2 %v3466_v33  ;;  %v3936_v34 = vld [vmem:[#allocation6 + $0x8c] sm:$0xf]  ;;  %v3273_v33 = vld [vmem:[#allocation6 + $0x48] sm:$0xf]  ;;  %v3409_v37 = vld [vmem:[#allocation6 + $0x150] sm:$0xf] }
 0x1a6   :  { %v1343_v4 = vsel %vm1342_vm0, %v4457_v41, %v1341_v42  ;;  %v1347_v48 = vmul.f32 1.442695, %v1346_v43  ;;  %v3689_v42 = vld [vmem:[#allocation6 + $0x388] sm:$0xf]  ;;  %v3307_v35 = vld [vmem:[#allocation6 + $0xa8] sm:$0xf0] }
 0x1a7   :  { %1345 = vst [vmem:[%s4513_s11] sm:$0xf] %v1343_v4  ;;  %v4036_v43 = vld [vmem:[#allocation6 + $0x3a4] sm:$0xf0] }
 0x1a8   :  { %4054 = vpow2.f32 %v1347_v48  ;;  %v3690_v46 = vor.u32 %v4036_v43, %v3689_v42  ;;  %v3401_v4 = vld [vmem:[#allocation6 + $0x148] sm:$0xf]  ;;  %v3928_v42 = vld [vmem:[#allocation6 + $0x4c] sm:$0xf] }
 0x1a9   :  { %v1337_v55 = vpop.f32.mrf.mxu3  ;;  %v3964_v48 = vld [vmem:[#allocation6 + $0x164] sm:$0xf0]  ;;  %2324 = vmatpush.bf16.msra.mxu2 %v3434_v39  ;;  %v3275_v43 = vld [vmem:[#allocation6 + $0x68] sm:$0xf0] }
 0x1aa   :  { %v3659_v55 = vld [vmem:[#allocation6 + $0x368] sm:$0xf0]  ;;  %v3402_v56 = vor.u32 %v3964_v48, %v3401_v4  ;;  %2337 = vmatpush.bf16.msra.mxu3 %v3690_v46  ;;  %v3278_v60 = vor.u32 %v3928_v42, %v3275_v43  ;;  %v3241_v39 = vld [vmem:[#allocation6 + $0x8] sm:$0xf]  ;;  %v3377_v43 = vld [vmem:[#allocation6 + $0x110] sm:$0xf] }
 0x1ab   :  { %v3662_v0 = vor.u32 %v4024_v54, %v3659_v55  ;;  %v3924_v46 = vld [vmem:[#allocation6 + $0x24] sm:$0xf0]  ;;  %v3499_v54 = vld [vmem:[#allocation6 + $0x228] sm:$0xf0] }
 0x1ac   :  { %v3242_v4 = vor.u32 %v3924_v46, %v3241_v39  ;;  %v3988_v48 = vld [vmem:[#allocation6 + $0x224] sm:$0xf0]  ;;  %v3502_v55 = vor.u32 %v3984_v53, %v3499_v54  ;;  %v4021_v39 = vld [vmem:[#allocation6 + $0x32c] sm:$0xf0]  ;;  %v3953_v46 = vld [vmem:[#allocation6 + $0x114] sm:$0xf] }
 0x1ad   :  { %2325 = vmatpush.bf16.msra.mxu2 %v3402_v56  ;;  %v1369_v56 = vld [vmem:[%s4509_s7] sm:$0x3] }
 0x1ae   :  { %v4055_v12 = vpop.eup %4054  ;;  %2338 = vmatpush.bf16.msra.mxu3 %v3658_v57  ;;  %v1371_v57 = vperm.slane %v1369_v56, 0 }
 0x1af   :  { %v1350_v21 = vmul.f32 %v4055_v12, %v1349_v6  ;;  %v3627_v6 = vld [vmem:[#allocation6 + $0x328] sm:$0xf0]  ;;  %v3593_v12 = vld [vmem:[#allocation6 + $0x2c8] sm:$0xf] }
 0x1b0   :  { %v3630_v15 = vor.u32 %v4016_v5, %v3627_v6  ;;  %v3594_v24 = vor.u32 %v4012_v18, %v3593_v12  ;;  %v4045_v5 = vld [vmem:[#allocation6 + $0x3ec] sm:$0xf0]  ;;  %v3977_v6 = vld [vmem:[#allocation6 + $0x1d4] sm:$0xf]  ;;  %v3474_v18 = vor.u32 %v3981_v2, %v3473_v1 }
 0x1b1   :  { %v1351_v32 = vadd.f32 %v1350_v21, %v4457_v41  ;;  %v3726_v41 = vor.u32 %v4040_v38, %v3723_v14  ;;  %v4008_v21 = vld [vmem:[#allocation6 + $0x2cc] sm:$0xf]  ;;  %2326 = vmatpush.bf16.msra.mxu2 %v3370_v7  ;;  %v3306_v38 = vor.u32 %v3940_v28, %v3305_v26  ;;  %v3562_v14 = vor.u32 %v4004_v13, %v3561_v29  ;;  %v3475_v7 = vld [vmem:[#allocation6 + $0x1f0] sm:$0xf0]  ;;  %v3313_v1 = vld [vmem:[#allocation6 + $0x90] sm:$0xf] }
 0x1b2   :  { %2339 = vmatpush.bf16.msra.mxu3 %v3626_v8  ;;  %v3730_v19 = vor.u32 %v4045_v5, %v3729_v3  ;;  %v3969_v26 = vld [vmem:[#allocation6 + $0x194] sm:$0xf]  ;;  %v3941_v2 = vld [vmem:[#allocation6 + $0xac] sm:$0xf0] }
 0x1b3   :  { %v1352_v16 = vpack.c.bf16 %v1351_v32, %v1351_v32  ;;  %v3598_v32 = vor.u32 %v4008_v21, %v3595_v22  ;;  %v3973_v21 = vld [vmem:[#allocation6 + $0x1ac] sm:$0xf0]  ;;  %v3478_v22 = vor.u32 %v3977_v6, %v3475_v7  ;;  %v3443_v28 = vld [vmem:[#allocation6 + $0x1b0] sm:$0xf0] }
 0x1b4   :  { %v4033_v29 = vld [vmem:[#allocation6 + $0x394] sm:$0xf]  ;;  %v3569_v6 = vld [vmem:[#allocation6 + $0x290] sm:$0xf] }
 0x1b5   :  { %1463 = vmatmul.bf16.vlgmr.msrb.gmra.mxu0 %v1352_v16  ;;  %1476 = vmatmul.bf16.vlgmr.msrb.gmra.mxu1 %v1352_v16  ;;  %v3310_v16 = vor.u32 %v3936_v34, %v3307_v35  ;;  %v3442_v35 = vor.u32 %v3973_v21, %v3441_v20  ;;  %v4005_v7 = vld [vmem:[#allocation6 + $0x2ac] sm:$0xf0] }
 0x1b6   :  { %2349 = vmatpush.bf16.msrb.mxu0 %v3470_v27  ;;  %2362 = vmatpush.bf16.msrb.mxu1 %v3726_v41  ;;  %v3274_v27 = vor.u32 %v3932_v61, %v3273_v33  ;;  %v3530_v41 = vor.u32 %v3996_v40, %v3529_v17  ;;  %v4029_v33 = vld [vmem:[#allocation6 + $0x36c] sm:$0xf0]  ;;  %v3961_v61 = vld [vmem:[#allocation6 + $0x154] sm:$0xf] }
 0x1b7   :  { %2327 = vmatpush.bf16.msra.mxu2 %v3338_v23  ;;  %2340 = vmatpush.bf16.msra.mxu3 %v3594_v24  ;;  %v3734_v23 = vor.u32 %v4041_v10, %v3731_v11  ;;  %v3697_v24 = vld [vmem:[#allocation6 + $0x390] sm:$0xf]  ;;  %v4025_v17 = vld [vmem:[#allocation6 + $0x354] sm:$0xf] }
 0x1b8   :  { %v3667_v40 = vld [vmem:[#allocation6 + $0x370] sm:$0xf0]  ;;  %v3281_v20 = vld [vmem:[#allocation6 + $0x50] sm:$0xf] }
 0x1b9   :  { %v4001_v10 = vld [vmem:[#allocation6 + $0x294] sm:$0xf]  ;;  %v3933_v21 = vld [vmem:[#allocation6 + $0x6c] sm:$0xf0] }
 0x1ba   :  { %2350 = vmatpush.bf16.msrb.mxu0 %v3438_v47  ;;  %2363 = vmatpush.bf16.msrb.mxu1 %v3694_v50  ;;  %v3497_v47 = vld [vmem:[#allocation6 + $0x208] sm:$0xf]  ;;  %v3243_v50 = vld [vmem:[#allocation6 + $0x28] sm:$0xf0]  ;;  %v3571_v11 = vld [vmem:[#allocation6 + $0x2b0] sm:$0xf0] }
 0x1bb   :  { %2328 = vmatpush.bf16.msra.mxu2 %v3306_v38  ;;  %2341 = vmatpush.bf16.msra.mxu3 %v3562_v14  ;;  %v3498_v51 = vor.u32 %v3988_v48, %v3497_v47  ;;  %v3246_v52 = vor.u32 %v3920_v49, %v3243_v50  ;;  %v3965_v38 = vld [vmem:[#allocation6 + $0x16c] sm:$0xf0]  ;;  %v3446_v14 = vor.u32 %v3969_v26, %v3443_v28  ;;  %v3379_v47 = vld [vmem:[#allocation6 + $0x130] sm:$0xf0] }
 0x1bc   :  { %v3410_v42 = vor.u32 %v3965_v38, %v3409_v37  ;;  %v3635_v48 = vld [vmem:[#allocation6 + $0x330] sm:$0xf0]  ;;  %v3378_v49 = vor.u32 %v3957_v44, %v3377_v43  ;;  %v3382_v53 = vor.u32 %v3953_v46, %v3379_v47  ;;  %v3505_v37 = vld [vmem:[#allocation6 + $0x210] sm:$0xf]  ;;  %v3978_v43 = vld [vmem:[#allocation6 + $0x1dc] sm:$0xf] }
 0x1bd   :  { %v3929_v26 = vld [vmem:[#allocation6 + $0x54] sm:$0xf]  ;;  %v3989_v38 = vld [vmem:[#allocation6 + $0x22c] sm:$0xf0] }
 0x1be   :  { %2351 = vmatpush.bf16.msrb.mxu0 %v3406_v58  ;;  %2364 = vmatpush.bf16.msrb.mxu1 %v3662_v0  ;;  %v1372_v58 = vperm.slane %v1369_v56, 1  ;;  %v4013_v56 = vld [vmem:[#allocation6 + $0x2ec] sm:$0xf0]  ;;  %v3283_v28 = vld [vmem:[#allocation6 + $0x70] sm:$0xf0] }
 0x1bf   :  { %2329 = vmatpush.bf16.msra.mxu2 %v3274_v27  ;;  %2342 = vmatpush.bf16.msra.mxu3 %v3530_v41  ;;  %v3411_v27 = vld [vmem:[#allocation6 + $0x170] sm:$0xf0] }
 0x1c0   :  { %v3414_v45 = vor.u32 %v3961_v61, %v3411_v27  ;;  %v3985_v61 = vld [vmem:[#allocation6 + $0x214] sm:$0xf] }
 0x1c1   :  { %v3507_v27 = vld [vmem:[#allocation6 + $0x230] sm:$0xf0] }
 0x1c2   :  { %2352 = vmatpush.bf16.msrb.mxu0 %v3374_v9  ;;  %2365 = vmatpush.bf16.msrb.mxu1 %v3630_v15  ;;  %v3510_v47 = vor.u32 %v3985_v61, %v3507_v27 }
 0x1c3   :  { %2330 = vmatpush.bf16.msra.mxu2 %v3242_v4  ;;  %2343 = vmatpush.bf16.msra.mxu3 %v3498_v51  ;;  %v4017_v4 = vld [vmem:[#allocation6 + $0x314] sm:$0xf]  ;;  %v3345_v51 = vld [vmem:[#allocation6 + $0xd0] sm:$0xf] }
 0x1c4   :  { %v3638_v54 = vor.u32 %v4017_v4, %v3635_v48 }
 0x1c6   :  { %2353 = vmatpush.bf16.msrb.mxu0 %v3342_v25  ;;  %2366 = vmatpush.bf16.msrb.mxu1 %v3598_v32  ;;  %v4037_v25 = vld [vmem:[#allocation6 + $0x3ac] sm:$0xf0]  ;;  %v3699_v32 = vld [vmem:[#allocation6 + $0x3b0] sm:$0xf0] }
 0x1c7   :  { %v3698_v36 = vor.u32 %v4037_v25, %v3697_v24  ;;  %v3537_v24 = vld [vmem:[#allocation6 + $0x250] sm:$0xf] }
 0x1c8   :  { %v3997_v25 = vld [vmem:[#allocation6 + $0x26c] sm:$0xf0] }
 0x1ca   :  { %2354 = vmatpush.bf16.msrb.mxu0 %v3310_v16  ;;  %2367 = vmatpush.bf16.msrb.mxu1 %v3566_v30  ;;  %v3702_v16 = vor.u32 %v4033_v29, %v3699_v32  ;;  %v3665_v30 = vld [vmem:[#allocation6 + $0x350] sm:$0xf]  ;;  %v3993_v29 = vld [vmem:[#allocation6 + $0x254] sm:$0xf] }
 0x1cb   :  { %v3666_v41 = vor.u32 %v4029_v33, %v3665_v30  ;;  %v3539_v32 = vld [vmem:[#allocation6 + $0x270] sm:$0xf0] }
 0x1cc   :  { %v3921_v30 = vld [vmem:[#allocation6 + $0x14] sm:$0xf] }
 0x1cd   :  { %v3251_v33 = vld [vmem:[#allocation6 + $0x30] sm:$0xf0] }
 0x1ce   :  { %2355 = vmatpush.bf16.msrb.mxu0 %v3278_v60  ;;  %2368 = vmatpush.bf16.msrb.mxu1 %v3534_v31  ;;  %v3670_v60 = vor.u32 %v4025_v17, %v3667_v40  ;;  %v3633_v31 = vld [vmem:[#allocation6 + $0x310] sm:$0xf]  ;;  %v3481_v17 = vld [vmem:[#allocation6 + $0x1d8] sm:$0xf]  ;;  %v3254_v46 = vor.u32 %v3921_v30, %v3251_v33  ;;  %v4010_v30 = vld [vmem:[#allocation6 + $0x2dc] sm:$0xf] }
 0x1cf   :  { %v3634_v50 = vor.u32 %v4021_v39, %v3633_v31  ;;  %v3982_v40 = vld [vmem:[#allocation6 + $0x1f4] sm:$0xf0]  ;;  %v4042_v31 = vld [vmem:[#allocation6 + $0x3dc] sm:$0xf] }
 0x1d0   :  { %v3739_v39 = vld [vmem:[#allocation6 + $0x3f8] sm:$0xf0]  ;;  %v3482_v4 = vor.u32 %v3982_v40, %v3481_v17  ;;  %v3321_v17 = vld [vmem:[#allocation6 + $0x98] sm:$0xf] }
 0x1d1   :  { %v3611_v33 = vld [vmem:[#allocation6 + $0x2f8] sm:$0xf0]  ;;  %v3942_v40 = vld [vmem:[#allocation6 + $0xb4] sm:$0xf0] }
 0x1d2   :  { %2356 = vmatpush.bf16.msrb.mxu0 %v3246_v52  ;;  %2369 = vmatpush.bf16.msrb.mxu1 %v3502_v55  ;;  %v3949_v52 = vld [vmem:[#allocation6 + $0xec] sm:$0xf0] }
 0x1d3   :  { %v3601_v55 = vld [vmem:[#allocation6 + $0x2d0] sm:$0xf] }
 0x232   :  { %v1464_v59 = vpop.f32.mrf.mxu0  ;;  %v1477_v62 = vpop.f32.mrf.mxu1 }
 0x233   :  { %v1465_v63 = vadd.f32 %v1464_v59, %v1371_v57  ;;  %v1478_v0 = vadd.f32 %v1477_v62, %v1372_v58  ;;  %v3945_v57 = vld [vmem:[#allocation6 + $0xd4] sm:$0xf] }
 0x234   :  { %v3347_v58 = vld [vmem:[#allocation6 + $0xf0] sm:$0xf0] }
 0x235   :  { %v1481_v8 = vmax.f32 %v1465_v63, 0.0  ;;  %v1482_v9 = vmax.f32 %v1478_v0, 0.0  ;;  %v4009_v59 = vld [vmem:[#allocation6 + $0x2d4] sm:$0xf]  ;;  %v3346_v63 = vor.u32 %v3949_v52, %v3345_v51  ;;  %v3602_v0 = vor.u32 %v4013_v56, %v3601_v55  ;;  %v3970_v55 = vld [vmem:[#allocation6 + $0x19c] sm:$0xf] }
 0x236   :  { %v3603_v62 = vld [vmem:[#allocation6 + $0x2f0] sm:$0xf0]  ;;  %v3350_v3 = vor.u32 %v3945_v57, %v3347_v58  ;;  %v3742_v52 = vor.u32 %v4042_v31, %v3739_v39  ;;  %v3451_v56 = vld [vmem:[#allocation6 + $0x1b8] sm:$0xf0] }
 0x237   :  { %v4471_v12 = vpack.c.bf16 %v1481_v8, %v1481_v8  ;;  %v4473_v15 = vpack.c.bf16 %v1482_v9, %v1482_v9  ;;  %v3606_v5 = vor.u32 %v4009_v59, %v3603_v62  ;;  %v3937_v8 = vld [vmem:[#allocation6 + $0x94] sm:$0xf]  ;;  %v4034_v57 = vld [vmem:[#allocation6 + $0x39c] sm:$0xf] }
 0x238   :  { %v3315_v9 = vld [vmem:[#allocation6 + $0xb0] sm:$0xf0]  ;;  %v3707_v58 = vld [vmem:[#allocation6 + $0x3b8] sm:$0xf0] }
 0x239   :  { %2279 = vmatmul.bf16.vlgmr.msrb.gmra.mxu2 %v4471_v12  ;;  %2292 = vmatmul.bf16.vlgmr.msrb.gmra.mxu3 %v4473_v15  ;;  %v4002_v31 = vld [vmem:[#allocation6 + $0x29c] sm:$0xf] }
 0x23a   :  { %2305 = vmatmul.bf16.vlgmr.msra.gmra.mxu0 %v4471_v12  ;;  %2318 = vmatmul.bf16.vlgmr.msra.gmra.mxu1 %v4473_v15  ;;  %v1466_v13 = vpop.f32.mrf.mxu0  ;;  %v1479_v34 = vpop.f32.mrf.mxu1  ;;  %v3579_v39 = vld [vmem:[#allocation6 + $0x2b8] sm:$0xf0] }
 0x23b   :  { %2375 = vmatpush.bf16.msrb.mxu2 %v3474_v18  ;;  %2388 = vmatpush.bf16.msrb.mxu3 %v3730_v19  ;;  %v3314_v18 = vor.u32 %v3941_v2, %v3313_v1  ;;  %v3570_v19 = vor.u32 %v4005_v7, %v3569_v6  ;;  %v3249_v13 = vld [vmem:[#allocation6 + $0x10] sm:$0xf]  ;;  %v3282_v34 = vor.u32 %v3933_v21, %v3281_v20  ;;  %v3962_v6 = vld [vmem:[#allocation6 + $0x15c] sm:$0xf] }
 0x23c   :  { %2401 = vmatpush.bf16.msra.mxu0 %v3478_v22  ;;  %2414 = vmatpush.bf16.msra.mxu1 %v3734_v23  ;;  %v3318_v22 = vor.u32 %v3937_v8, %v3315_v9  ;;  %v3574_v23 = vor.u32 %v4001_v10, %v3571_v11  ;;  %v3454_v1 = vor.u32 %v3970_v55, %v3451_v56  ;;  %v3419_v7 = vld [vmem:[#allocation6 + $0x178] sm:$0xf0] }
 0x23d   :  { %v3710_v2 = vor.u32 %v4034_v57, %v3707_v58  ;;  %v4026_v8 = vld [vmem:[#allocation6 + $0x35c] sm:$0xf]  ;;  %v3422_v20 = vor.u32 %v3962_v6, %v3419_v7 }
 0x23e   :  { %v3675_v9 = vld [vmem:[#allocation6 + $0x378] sm:$0xf0] }
 0x23f   :  { %2376 = vmatpush.bf16.msrb.mxu2 %v3442_v35  ;;  %2389 = vmatpush.bf16.msrb.mxu3 %v3698_v36  ;;  %v3538_v35 = vor.u32 %v3997_v25, %v3537_v24  ;;  %v3925_v36 = vld [vmem:[#allocation6 + $0x2c] sm:$0xf0]  ;;  %v3678_v21 = vor.u32 %v4026_v8, %v3675_v9  ;;  %v3954_v24 = vld [vmem:[#allocation6 + $0x11c] sm:$0xf] }
 0x240   :  { %2402 = vmatpush.bf16.msra.mxu0 %v3446_v14  ;;  %2415 = vmatpush.bf16.msra.mxu1 %v3702_v16  ;;  %v3286_v14 = vor.u32 %v3929_v26, %v3283_v28  ;;  %v3542_v16 = vor.u32 %v3993_v29, %v3539_v32  ;;  %v3250_v44 = vor.u32 %v3925_v36, %v3249_v13  ;;  %v3387_v25 = vld [vmem:[#allocation6 + $0x138] sm:$0xf0]  ;;  %v3353_v13 = vld [vmem:[#allocation6 + $0xd8] sm:$0xf] }
 0x241   :  { %v4018_v26 = vld [vmem:[#allocation6 + $0x31c] sm:$0xf] }
 0x242   :  { %v3643_v28 = vld [vmem:[#allocation6 + $0x338] sm:$0xf0] }
 0x243   :  { %2377 = vmatpush.bf16.msrb.mxu2 %v3410_v42  ;;  %2390 = vmatpush.bf16.msrb.mxu3 %v3666_v41  ;;  %v3737_v42 = vld [vmem:[#allocation6 + $0x3d8] sm:$0xf]  ;;  %v3646_v36 = vor.u32 %v4018_v26, %v3643_v28  ;;  %v3994_v55 = vld [vmem:[#allocation6 + $0x25c] sm:$0xf] }
 0x244   :  { %2403 = vmatpush.bf16.msra.mxu0 %v3414_v45  ;;  %2416 = vmatpush.bf16.msra.mxu1 %v3670_v60  ;;  %v4046_v41 = vld [vmem:[#allocation6 + $0x3f4] sm:$0xf0]  ;;  %v3506_v45 = vor.u32 %v3989_v38, %v3505_v37  ;;  %v3483_v60 = vld [vmem:[#allocation6 + $0x1f8] sm:$0xf0] }
 0x245   :  { %v3738_v48 = vor.u32 %v4046_v41, %v3737_v42  ;;  %v3486_v51 = vor.u32 %v3978_v43, %v3483_v60  ;;  %v3609_v37 = vld [vmem:[#allocation6 + $0x2d8] sm:$0xf]  ;;  %v3614_v41 = vor.u32 %v4010_v30, %v3611_v33  ;;  %v3323_v60 = vld [vmem:[#allocation6 + $0xb8] sm:$0xf0] }
 0x246   :  { %v4014_v38 = vld [vmem:[#allocation6 + $0x2f4] sm:$0xf0]  ;;  %v3547_v56 = vld [vmem:[#allocation6 + $0x278] sm:$0xf0] }
 0x247   :  { %2378 = vmatpush.bf16.msrb.mxu2 %v3378_v49  ;;  %2391 = vmatpush.bf16.msrb.mxu3 %v3634_v50  ;;  %v3449_v49 = vld [vmem:[#allocation6 + $0x198] sm:$0xf]  ;;  %v3610_v27 = vor.u32 %v4014_v38, %v3609_v37  ;;  %v3986_v6 = vld [vmem:[#allocation6 + $0x21c] sm:$0xf] }
 0x248   :  { %2404 = vmatpush.bf16.msra.mxu0 %v3382_v53  ;;  %2417 = vmatpush.bf16.msra.mxu1 %v3638_v54  ;;  %v3974_v50 = vld [vmem:[#allocation6 + $0x1b4] sm:$0xf0]  ;;  %v3515_v7 = vld [vmem:[#allocation6 + $0x238] sm:$0xf0] }
 0x249   :  { %2331 = vmatmul.bf16.vlgmr.msra.gmra.mxu2 %v4471_v12  ;;  %2344 = vmatmul.bf16.vlgmr.msra.gmra.mxu3 %v4473_v15  ;;  %v3705_v53 = vld [vmem:[#allocation6 + $0x398] sm:$0xf]  ;;  %v3450_v59 = vor.u32 %v3974_v50, %v3449_v49  ;;  %v3582_v50 = vor.u32 %v4002_v31, %v3579_v39 }
 0x24a   :  { %2357 = vmatmul.bf16.vlgmr.msrb.gmra.mxu0 %v4471_v12  ;;  %2370 = vmatmul.bf16.vlgmr.msrb.gmra.mxu1 %v4473_v15  ;;  %v4038_v54 = vld [vmem:[#allocation6 + $0x3b4] sm:$0xf0] }
 0x24b   :  { %2379 = vmatpush.bf16.msrb.mxu2 %v3346_v63  ;;  %2392 = vmatpush.bf16.msrb.mxu3 %v3602_v0  ;;  %v3706_v62 = vor.u32 %v4038_v54, %v3705_v53  ;;  %v3417_v63 = vld [vmem:[#allocation6 + $0x158] sm:$0xf]  ;;  %v3930_v53 = vld [vmem:[#allocation6 + $0x5c] sm:$0xf] }
 0x24c   :  { %2405 = vmatpush.bf16.msra.mxu0 %v3350_v3  ;;  %2418 = vmatpush.bf16.msra.mxu1 %v3606_v5  ;;  %v3966_v0 = vld [vmem:[#allocation6 + $0x174] sm:$0xf0]  ;;  %v3291_v54 = vld [vmem:[#allocation6 + $0x78] sm:$0xf0] }
 0x24d   :  { %v3673_v3 = vld [vmem:[#allocation6 + $0x358] sm:$0xf]  ;;  %v3418_v10 = vor.u32 %v3966_v0, %v3417_v63  ;;  %v3294_v63 = vor.u32 %v3930_v53, %v3291_v54  ;;  %v3550_v0 = vor.u32 %v3994_v55, %v3547_v56 }
 0x24e   :  { %v4030_v5 = vld [vmem:[#allocation6 + $0x374] sm:$0xf0] }
 0x24f   :  { %2380 = vmatpush.bf16.msrb.mxu2 %v3314_v18  ;;  %2393 = vmatpush.bf16.msrb.mxu3 %v3570_v19  ;;  %v3674_v11 = vor.u32 %v4030_v5, %v3673_v3  ;;  %v3385_v18 = vld [vmem:[#allocation6 + $0x118] sm:$0xf]  ;;  %v3922_v3 = vld [vmem:[#allocation6 + $0x1c] sm:$0xf] }
 0x250   :  { %2406 = vmatpush.bf16.msra.mxu0 %v3318_v22  ;;  %2419 = vmatpush.bf16.msra.mxu1 %v3574_v23  ;;  %v3958_v19 = vld [vmem:[#allocation6 + $0x134] sm:$0xf0]  ;;  %v3259_v5 = vld [vmem:[#allocation6 + $0x38] sm:$0xf0] }
 0x251   :  { %v3641_v22 = vld [vmem:[#allocation6 + $0x318] sm:$0xf]  ;;  %v3386_v29 = vor.u32 %v3958_v19, %v3385_v18 }
 0x252   :  { %v4022_v23 = vld [vmem:[#allocation6 + $0x334] sm:$0xf0] }
 0x253   :  { %2381 = vmatpush.bf16.msrb.mxu2 %v3282_v34  ;;  %2394 = vmatpush.bf16.msrb.mxu3 %v3538_v35  ;;  %v3642_v32 = vor.u32 %v4022_v23, %v3641_v22  ;;  %v3950_v34 = vld [vmem:[#allocation6 + $0xf4] sm:$0xf0]  ;;  %v3390_v35 = vor.u32 %v3954_v24, %v3387_v25 }
 0x254   :  { %2407 = vmatpush.bf16.msra.mxu0 %v3286_v14  ;;  %2420 = vmatpush.bf16.msra.mxu1 %v3542_v16  ;;  %v3946_v14 = vld [vmem:[#allocation6 + $0xdc] sm:$0xf]  ;;  %v3354_v61 = vor.u32 %v3950_v34, %v3353_v13  ;;  %v3577_v43 = vld [vmem:[#allocation6 + $0x298] sm:$0xf] }
 0x255   :  { %v3355_v16 = vld [vmem:[#allocation6 + $0xf8] sm:$0xf0] }
 0x256   :  { %v3358_v42 = vor.u32 %v3946_v14, %v3355_v16  ;;  %v1613_v18 = vld [vmem:[%s4511_s9] sm:$0xff] }
 0x257   :  { %2382 = vmatpush.bf16.msrb.mxu2 %v3250_v44  ;;  %2395 = vmatpush.bf16.msrb.mxu3 %v3506_v45  ;;  %v4006_v44 = vld [vmem:[#allocation6 + $0x2b4] sm:$0xf0]  ;;  %v3938_v45 = vld [vmem:[#allocation6 + $0x9c] sm:$0xf]  ;;  %v1616_v19 = vperm.slane %v1613_v18, 1  ;;  %v1615_v23 = vperm.slane %v1613_v18, 0 }
 0x258   :  { %2408 = vmatpush.bf16.msra.mxu0 %v3254_v46  ;;  %2421 = vmatpush.bf16.msra.mxu1 %v3510_v47  ;;  %v3322_v46 = vor.u32 %v3942_v40, %v3321_v17  ;;  %v3578_v47 = vor.u32 %v4006_v44, %v3577_v43  ;;  %v3326_v49 = vor.u32 %v3938_v45, %v3323_v60  ;;  %v1617_v45 = vperm.slane %v1613_v18, 2 }
 0x259   :  { %v1618_v60 = vperm.slane %v1613_v18, 3  ;;  %v1619_v31 = vperm.slane %v1613_v18, 4  ;;  %v1621_v55 = vperm.slane %v1613_v18, 6 }
 0x25a   :  { %2383 = vmatmul.bf16.vlgmr.msrb.gmra.mxu2 %v4471_v12  ;;  %2396 = vmatmul.bf16.vlgmr.msrb.gmra.mxu3 %v4473_v15 }
 0x25b   :  { %2427 = vmatpush.bf16.msra.mxu2 %v3482_v4  ;;  %2440 = vmatpush.bf16.msra.mxu3 %v3738_v48  ;;  %v3289_v4 = vld [vmem:[#allocation6 + $0x58] sm:$0xf] }
 0x25c   :  { %2453 = vmatpush.bf16.msrb.mxu0 %v3486_v51  ;;  %2466 = vmatpush.bf16.msrb.mxu1 %v3742_v52  ;;  %v3934_v48 = vld [vmem:[#allocation6 + $0x74] sm:$0xf0] }
 0x25d   :  { %2409 = vmatmul.bf16.vlgmr.msra.gmra.mxu0 %v4471_v12  ;;  %2422 = vmatmul.bf16.vlgmr.msra.gmra.mxu1 %v4473_v15  ;;  %v3545_v51 = vld [vmem:[#allocation6 + $0x258] sm:$0xf]  ;;  %v3290_v57 = vor.u32 %v3934_v48, %v3289_v4 }
 0x25e   :  { %v3998_v52 = vld [vmem:[#allocation6 + $0x274] sm:$0xf0] }
 0x25f   :  { %2428 = vmatpush.bf16.msra.mxu2 %v3450_v59  ;;  %2441 = vmatpush.bf16.msra.mxu3 %v3706_v62  ;;  %v3546_v58 = vor.u32 %v3998_v52, %v3545_v51  ;;  %v3257_v59 = vld [vmem:[#allocation6 + $0x18] sm:$0xf] }
 0x260   :  { %2454 = vmatpush.bf16.msrb.mxu0 %v3454_v1  ;;  %2467 = vmatpush.bf16.msrb.mxu1 %v3710_v2  ;;  %v3926_v62 = vld [vmem:[#allocation6 + $0x34] sm:$0xf0] }
 0x261   :  { %v3513_v1 = vld [vmem:[#allocation6 + $0x218] sm:$0xf]  ;;  %v3258_v8 = vor.u32 %v3926_v62, %v3257_v59 }
 0x262   :  { %v3990_v2 = vld [vmem:[#allocation6 + $0x234] sm:$0xf0] }
 0x263   :  { %2429 = vmatpush.bf16.msra.mxu2 %v3418_v10  ;;  %2442 = vmatpush.bf16.msra.mxu3 %v3674_v11  ;;  %v3514_v9 = vor.u32 %v3990_v2, %v3513_v1  ;;  %v3262_v10 = vor.u32 %v3922_v3, %v3259_v5  ;;  %v3518_v11 = vor.u32 %v3986_v6, %v3515_v7 }
 0x264   :  { %2455 = vmatpush.bf16.msrb.mxu0 %v3422_v20  ;;  %2468 = vmatpush.bf16.msrb.mxu1 %v3678_v21 }
 0x267   :  { %2430 = vmatpush.bf16.msra.mxu2 %v3386_v29  ;;  %2443 = vmatpush.bf16.msra.mxu3 %v3642_v32 }
 0x268   :  { %2456 = vmatpush.bf16.msrb.mxu0 %v3390_v35  ;;  %2469 = vmatpush.bf16.msrb.mxu1 %v3646_v36 }
 0x26b   :  { %2431 = vmatpush.bf16.msra.mxu2 %v3354_v61  ;;  %2444 = vmatpush.bf16.msra.mxu3 %v3610_v27 }
 0x26c   :  { %2457 = vmatpush.bf16.msrb.mxu0 %v3358_v42  ;;  %2470 = vmatpush.bf16.msrb.mxu1 %v3614_v41 }
 0x26f   :  { %2432 = vmatpush.bf16.msra.mxu2 %v3322_v46  ;;  %2445 = vmatpush.bf16.msra.mxu3 %v3578_v47  ;;  %v1620_v46 = vperm.slane %v1613_v18, 5 }
 0x270   :  { %2458 = vmatpush.bf16.msrb.mxu0 %v3326_v49  ;;  %2471 = vmatpush.bf16.msrb.mxu1 %v3582_v50  ;;  %v1622_v50 = vperm.slane %v1613_v18, 7 }
 0x273   :  { %2433 = vmatpush.bf16.msra.mxu2 %v3290_v57  ;;  %2446 = vmatpush.bf16.msra.mxu3 %v3546_v58 }
 0x274   :  { %2459 = vmatpush.bf16.msrb.mxu0 %v3294_v63  ;;  %2472 = vmatpush.bf16.msrb.mxu1 %v3550_v0 }
 0x277   :  { %2434 = vmatpush.bf16.msra.mxu2 %v3258_v8  ;;  %2447 = vmatpush.bf16.msra.mxu3 %v3514_v9 }
 0x278   :  { %2460 = vmatpush.bf16.msrb.mxu0 %v3262_v10  ;;  %2473 = vmatpush.bf16.msrb.mxu1 %v3518_v11 }
 0x27a   :  { %2435 = vmatmul.bf16.vlgmr.msra.gmra.mxu2 %v4471_v12  ;;  %2448 = vmatmul.bf16.vlgmr.msra.gmra.mxu3 %v4473_v15 }
 0x27b   :  { %2461 = vmatmul.bf16.vlgmr.msrb.gmra.mxu0 %v4471_v12  ;;  %2474 = vmatmul.bf16.vlgmr.msrb.gmra.mxu1 %v4473_v15 }
 0x2b7   :  { %v2306_v20 = vpop.f32.mrf.mxu0  ;;  %v2319_v21 = vpop.f32.mrf.mxu1 }
 0x2b8   :  { %v2307_v22 = vadd.f32 %v2306_v20, %v1616_v19 }
 0x2ba   :  { %v2320_v24 = vadd.f32 %v2319_v21, %v2307_v22 }
 0x2bc   :  { %v2280_v25 = vpop.f32.mrf.mxu2  ;;  %v2293_v26 = vpop.f32.mrf.mxu3 }
 0x2bd   :  { %v2281_v28 = vadd.f32 %v2280_v25, %v1615_v23 }
 0x2bf   :  { %v2294_v29 = vadd.f32 %v2293_v26, %v2281_v28  ;;  %v2308_v32 = vpop.f32.mrf.mxu0  ;;  %v2321_v13 = vpop.f32.mrf.mxu1 }
 0x2c1   :  { %v4494_v34 = vpack.c.bf16 %v2320_v24, %v2294_v29 }
 0x2c3   :  { %v2487_v8 = vrot.slane %v4494_v34, 3 }
 0x2c4   :  { %v2282_v12 = vpop.f32.mrf.mxu2  ;;  %v2295_v15 = vpop.f32.mrf.mxu3 }
 0x2c5   :  { %v2497_v23 = vsel %vm2494_vm2, %v4494_v34, %v2487_v8 }
 0x2c7   :  { %v2358_v35 = vpop.f32.mrf.mxu0  ;;  %v2371_v36 = vpop.f32.mrf.mxu1 }
 0x2c8   :  { %v2359_v47 = vadd.f32 %v2358_v35, %v1618_v60 }
 0x2ca   :  { %v2372_v53 = vadd.f32 %v2371_v36, %v2359_v47 }
 0x2cc   :  { %v2332_v37 = vpop.f32.mrf.mxu2  ;;  %v2345_v38 = vpop.f32.mrf.mxu3 }
 0x2cd   :  { %v2333_v39 = vadd.f32 %v2332_v37, %v1617_v45 }
 0x2cf   :  { %v2360_v14 = vpop.f32.mrf.mxu0  ;;  %v2373_v16 = vpop.f32.mrf.mxu1  ;;  %v2346_v48 = vadd.f32 %v2345_v38, %v2333_v39 }
 0x2d1   :  { %v2480_v56 = vpack.c.bf16 %v2372_v53, %v2346_v48 }
 0x2d3   :  { %v2488_v1 = vrot.slane %v2480_v56, 6  ;;  %v2489_v2 = vrot.slane %v2480_v56, 1 }
 0x2d4   :  { %v2334_v30 = vpop.f32.mrf.mxu2  ;;  %v2347_v33 = vpop.f32.mrf.mxu3 }
 0x2d5   :  { %v2501_v18 = vsel %vm2498_vm1, %v2488_v1, %v2489_v2 }
 0x2d6   :  { %v2502_v26 = vsel %vm1342_vm0, %v2497_v23, %v2501_v18 }
 0x2da   :  { %v2410_v61 = vpop.f32.mrf.mxu0  ;;  %v2423_v27 = vpop.f32.mrf.mxu1 }
 0x2db   :  { %v2411_v49 = vadd.f32 %v2410_v61, %v1620_v46 }
 0x2dd   :  { %v2384_v17 = vpop.f32.mrf.mxu2  ;;  %v2397_v40 = vpop.f32.mrf.mxu3  ;;  %v2424_v57 = vadd.f32 %v2423_v27, %v2411_v49 }
 0x2de   :  { %v2385_v4 = vadd.f32 %v2384_v17, %v1619_v31 }
 0x2e0   :  { %v2398_v54 = vadd.f32 %v2397_v40, %v2385_v4 }
 0x2e2   :  { %v2412_v42 = vpop.f32.mrf.mxu0  ;;  %v2425_v41 = vpop.f32.mrf.mxu1  ;;  %v2481_v63 = vpack.c.bf16 %v2424_v57, %v2398_v54 }
 0x2e4   :  { %v2490_v9 = vrot.slane %v2481_v63, 4  ;;  %v2491_v10 = vrot.slane %v2481_v63, 7 }
 0x2e5   :  { %v2386_v43 = vpop.f32.mrf.mxu2  ;;  %v2399_v44 = vpop.f32.mrf.mxu3 }
 0x2e6   :  { %v2506_v24 = vsel %vm2503_vm3, %v2490_v9, %v2491_v10 }
 0x2f8   :  { %v2462_v51 = vpop.f32.mrf.mxu0  ;;  %v2475_v52 = vpop.f32.mrf.mxu1 }
 0x2f9   :  { %v2463_v58 = vadd.f32 %v2462_v51, %v1622_v50 }
 0x2fb   :  { %v2476_v3 = vadd.f32 %v2475_v52, %v2463_v58 }
 0x2fd   :  { %v2436_v59 = vpop.f32.mrf.mxu2  ;;  %v2449_v62 = vpop.f32.mrf.mxu3 }
 0x2fe   :  { %v2437_v0 = vadd.f32 %v2436_v59, %v1621_v55 }
 0x300   :  { %v2450_v5 = vadd.f32 %v2449_v62, %v2437_v0  ;;  %v2464_v6 = vpop.f32.mrf.mxu0  ;;  %v2477_v7 = vpop.f32.mrf.mxu1 }
 0x302   :  { %v2482_v11 = vpack.c.bf16 %v2476_v3, %v2450_v5 }
 0x304   :  { %v2492_v19 = vrot.slane %v2482_v11, 2  ;;  %v2493_v20 = vrot.slane %v2482_v11, 5 }
 0x305   :  { %v2438_v21 = vpop.f32.mrf.mxu2  ;;  %v2451_v22 = vpop.f32.mrf.mxu3 }
 0x306   :  { %v2510_v25 = vsel %vm2507_vm4, %v2492_v19, %v2493_v20 }
 0x307   :  { %v2512_v28 = vsel %vm2511_vm5, %v2506_v24, %v2510_v25 }
 0x308   :  { %v2514_v29 = vsel %vm2513_vm6, %v2502_v26, %v2512_v28 }
 0x309   :  { %2516 = vst [vmem:[%s4512_s10] sm:$0xff] %v2514_v29 }
 0x30a   :  { %2525 = vsyncpa [#allocation3], 1 }
 0x30b   :  { %2526 = vsyncpa [#allocation5], 1 }

</bundles_post_ra>
